<compile_context>
chip_gen: v6e
topology: v6e:2x2x1
jax: 0.10.0
libtpu: 0.0.40
codegen_flags: <defaults>
</compile_context>

<pallas_src>
import jax
import jax.numpy as jnp
import numpy as np
from jax.experimental import pallas as pl
from jax.experimental.pallas import tpu as pltpu

L_IN = 50                                             # forced by view(-1, 23*16) etc.
C_MID = 8
C_OUT = 16
BRANCH_K = (5, 10, 20)
BRANCH_LOUT = tuple(L_IN - k + 1 for k in BRANCH_K)   # (46, 41, 31)
BRANCH_LP = tuple(lo // 2 for lo in BRANCH_LOUT)      # (23, 20, 15)  after MaxPool1d(2,2)
FEAT_DIM = sum(C_OUT * lp for lp in BRANCH_LP)        # 928

_HIGH = jax.lax.Precision.HIGHEST


# --------------------------------------------------------------------------
# Fused kernel: conv branches as 2 Toeplitz MXU matmuls + tanh(max(.)+b)
# -> MLP head (bf16 MXU matmuls, f32 accumulate) -> VPU reduction last layer.
# --------------------------------------------------------------------------
def _fused_kernel(x_ref, we_ref, wo_ref, bconv_ref,
                  wa_ref, ba_ref, wb_ref, bb_ref, wc_ref, bc_ref,
                  o_ref):
    x = x_ref[...].astype(jnp.bfloat16)                           # (TB, 50)

    # All 3 branches + maxpool phases in two MXU passes, landing lane-dense (TB, 928).
    even = jnp.dot(x, we_ref[...], preferred_element_type=jnp.float32)
    odd = jnp.dot(x, wo_ref[...], preferred_element_type=jnp.float32)
    # MaxPool1d(2,2) before bias/tanh (exact: bias identical per pooled pair, tanh monotone).
    feat = jnp.tanh(jnp.maximum(even, odd) + bconv_ref[...])      # (TB, 928) f32

    # MLP head: bf16 operands, f32 accumulation on the MXU; elementwise in f32.
    h1 = jnp.tanh(jnp.dot(feat.astype(jnp.bfloat16), wa_ref[...],
                          preferred_element_type=jnp.float32) + ba_ref[...])
    h2 = jnp.tanh(jnp.dot(h1.astype(jnp.bfloat16), wb_ref[...],
                          preferred_element_type=jnp.float32) + bb_ref[...])
    # Linear(128, 1): VPU multiply + lane reduction (avoid a 1-column MXU matmul).
    o_ref[...] = jnp.sum(h2 * wc_ref[...], axis=1, keepdims=True) + bc_ref[...]


# --------------------------------------------------------------------------
# Parameter init (PyTorch-native layouts, PyTorch-default-style uniform bounds)
# --------------------------------------------------------------------------
def init_params(key):
    def uniform(k, shape, bound):
        return jax.random.uniform(k, shape, jnp.float32, -bound, bound)

    keys = iter(jax.random.split(key, 32))
    params = {}
    for name, K in zip(("br1", "br2", "br3"), BRANCH_K):
        bd1 = 1.0 / np.sqrt(1 * 1)
        bd2 = 1.0 / np.sqrt(C_MID * K)
        params[name] = dict(
            w1=uniform(next(keys), (C_MID, 1, 1), bd1),      # Conv1d(1, 8, 1).weight
            b1=uniform(next(keys), (C_MID,), bd1),
            w2=uniform(next(keys), (C_OUT, C_MID, K), bd2),  # Conv1d(8, 16, K).weight
            b2=uniform(next(keys), (C_OUT,), bd2),
        )
    for i, (fin, fout) in enumerate([(FEAT_DIM, 512), (512, 128), (128, 1)]):
        bd = 1.0 / np.sqrt(fin)
        params[f"fc{i}"] = dict(w=uniform(next(keys), (fout, fin), bd),   # (out, in)
                                b=uniform(next(keys), (fout,), bd))
    return params


def pack_params(params):
    """Collapse each branch's two convs + maxpool phases into banded Toeplitz matrices.

    Column layout matches torch: col = branch_offset + out_channel * Lp + pooled_pos.
      even[b, col] = sum_k w_eff[o, k] * x[b, 2p + k]
      odd [b, col] = sum_k w_eff[o, k] * x[b, 2p + 1 + k]
    """
    W_even = np.zeros((L_IN, FEAT_DIM), np.float32)
    W_odd = np.zeros((L_IN, FEAT_DIM), np.float32)
    bias = np.zeros((FEAT_DIM,), np.float32)

    col0 = 0
    for name, K, Lp in zip(("br1", "br2", "br3"), BRANCH_K, BRANCH_LP):
        p = params[name]
        w1 = np.asarray(p["w1"], np.float32).reshape(C_MID)            # (8,)
        w2 = np.asarray(p["w2"], np.float32)                           # (16, 8, K)
        b1 = np.asarray(p["b1"], np.float32)
        b2 = np.asarray(p["b2"], np.float32)
        w_eff = np.einsum("ock,c->ok", w2, w1)                         # (16, K)
        b_eff = np.einsum("ock,c->o", w2, b1) + b2                     # (16,)
        for o in range(C_OUT):
            for pp in range(Lp):
                col = col0 + o * Lp + pp
                bias[col] = b_eff[o]
                for k in range(K):
                    W_even[2 * pp + k, col] = w_eff[o, k]
                    W_odd[2 * pp + 1 + k, col] = w_eff[o, k]
        col0 += C_OUT * Lp

    packed = {
        "we": jnp.asarray(W_even, jnp.bfloat16),                       # (50, 928)
        "wo": jnp.asarray(W_odd, jnp.bfloat16),                        # (50, 928)
        "bconv": jnp.asarray(bias.reshape(1, FEAT_DIM), jnp.float32),  # (1, 928)
        "wa": params["fc0"]["w"].T.astype(jnp.bfloat16),               # (928, 512)
        "ba": params["fc0"]["b"].reshape(1, -1).astype(jnp.float32),
        "wb": params["fc1"]["w"].T.astype(jnp.bfloat16),               # (512, 128)
        "bb": params["fc1"]["b"].reshape(1, -1).astype(jnp.float32),
        "wc": params["fc2"]["w"].reshape(1, -1).astype(jnp.float32),   # (1, 128)
        "bc": params["fc2"]["b"].reshape(1, 1).astype(jnp.float32),    # (1, 1)
    }
    return packed


# --------------------------------------------------------------------------
# Forward wrapper
# --------------------------------------------------------------------------
def _choose_tile(B):
    """Batch tile: single block for small B; 128/256 tiles for large B.

    Gives >=2 grid steps for B >= 256 (v7x megacore sharding) and 256-row tiles for
    very large B (fills the v6e/v7x 256-wide MXU, fewer per-step overheads)."""
    if B <= 128:
        return B
    if B <= 384:
        return 128
    return 256


@jax.jit
def inception_forward(x, packed):
    B = x.shape[0]
    x2 = x.reshape(B, L_IN).astype(jnp.float32)       # drop channel dim (C=1)

    TB = _choose_tile(B)
    B_pad = pl.cdiv(B, TB) * TB
    if B_pad != B:                                    # pad to a tile multiple (static)
        x2 = jnp.pad(x2, ((0, B_pad - B), (0, 0)))
    grid = (B_pad // TB,)

    def full_spec(arr):
        rank = arr.ndim
        return pl.BlockSpec(arr.shape, lambda i, r=rank: (0,) * r)

    out = pl.pallas_call(
        _fused_kernel,
        out_shape=jax.ShapeDtypeStruct((B_pad, 1), jnp.float32),
        grid=grid,
        in_specs=[
            pl.BlockSpec((TB, L_IN), lambda i: (i, 0)),   # x tile
            full_spec(packed["we"]), full_spec(packed["wo"]), full_spec(packed["bconv"]),
            full_spec(packed["wa"]), full_spec(packed["ba"]),
            full_spec(packed["wb"]), full_spec(packed["bb"]),
            full_spec(packed["wc"]), full_spec(packed["bc"]),
        ],
        out_specs=pl.BlockSpec((TB, 1), lambda i: (i, 0)),
        compiler_params=pltpu.CompilerParams(dimension_semantics=("parallel",)),
    )(x2, packed["we"], packed["wo"], packed["bconv"],
      packed["wa"], packed["ba"], packed["wb"], packed["bb"],
      packed["wc"], packed["bc"])

    return out[:B] if B_pad != B else out


# --------------------------------------------------------------------------
# Pure-JAX f32 reference (original two-conv / tanh / maxpool / MLP form)
# --------------------------------------------------------------------------
@jax.jit
def reference_forward(x, params):
    B = x.shape[0]
    xr = x.reshape(B, L_IN).astype(jnp.float32)
    feats = []
    for name, K, Lout, Lp in zip(("br1", "br2", "br3"), BRANCH_K, BRANCH_LOUT, BRANCH_LP):
        p = params[name]
        h = p["w1"].reshape(1, C_MID, 1) * xr[:, None, :] + p["b1"].reshape(1, C_MID, 1)
        y = jnp.zeros((B, C_OUT, Lout), jnp.float32)
        for k in range(K):
            y = y + jnp.einsum("oc,bcl->bol", p["w2"][:, :, k], h[:, :, k:k + Lout],
                               precision=_HIGH)
        t = jnp.tanh(y + p["b2"].reshape(1, C_OUT, 1))
        pooled = jnp.maximum(t[:, :, 0:2 * Lp:2], t[:, :, 1:2 * Lp:2])
        feats.append(pooled.reshape(B, C_OUT * Lp))
    feat = jnp.concatenate(feats, axis=1)             # (B, 928)

    def dense(v, w, b):
        return jnp.dot(v, w.T, precision=_HIGH) + b.reshape(1, -1)

    h1 = jnp.tanh(dense(feat, params["fc0"]["w"], params["fc0"]["b"]))
    h2 = jnp.tanh(dense(h1, params["fc1"]["w"], params["fc1"]["b"]))
    return dense(h2, params["fc2"]["w"], params["fc2"]["b"])


if __name__ == "__main__":
    key = jax.random.PRNGKey(0)
    pkey, xkey = jax.random.split(key)
    params = init_params(pkey)
    packed = pack_params(params)
    x = jax.random.normal(xkey, (2, 1, L_IN), jnp.float32)   # (B, C=1, L=50), NCW like PyTorch

    out = inception_forward(x, packed)
    out = jax.block_until_ready(out)
    assert out.shape == (2, 1)

    ref = jax.block_until_ready(reference_forward(x, params))
    # bf16 MXU operands in the kernel vs pure-f32 reference -> ~1e-3 level differences.
    np.testing.assert_allclose(np.asarray(out), np.asarray(ref), rtol=1e-2, atol=1e-2)
    print("KERNEL_OK")
</pallas_src>

<mosaic_0001>
module attributes {stable_mosaic.version = 11 : i64} {
  func.func @_fused_kernel(%arg0: i32, %arg1: memref<2x50xf32, #tpu.memory_space<vmem>>, %arg2: memref<50x928xbf16, #tpu.memory_space<vmem>>, %arg3: memref<50x928xbf16, #tpu.memory_space<vmem>>, %arg4: memref<1x928xf32, #tpu.memory_space<vmem>>, %arg5: memref<928x512xbf16, #tpu.memory_space<vmem>>, %arg6: memref<1x512xf32, #tpu.memory_space<vmem>>, %arg7: memref<512x128xbf16, #tpu.memory_space<vmem>>, %arg8: memref<1x128xf32, #tpu.memory_space<vmem>>, %arg9: memref<1x128xf32, #tpu.memory_space<vmem>>, %arg10: memref<1x1xf32, #tpu.memory_space<vmem>>, %arg11: memref<2x1xf32, #tpu.memory_space<vmem>>) attributes {dimension_semantics = [#tpu.dimension_semantics<parallel>], iteration_bounds = array<i64: 1>, scalar_prefetch = 0 : i64, scratch_operands = 0 : i64, tpu.core_type = #tpu.core_type<tc>, window_params = [{transform_indices = @transform_0, window_bounds = array<i64: 2, 50>}, {pipeline_mode = #tpu.pipeline_mode<synchronous>, transform_indices = @transform_1, window_bounds = array<i64: 50, 928>}, {pipeline_mode = #tpu.pipeline_mode<synchronous>, transform_indices = @transform_2, window_bounds = array<i64: 50, 928>}, {pipeline_mode = #tpu.pipeline_mode<synchronous>, transform_indices = @transform_3, window_bounds = array<i64: 1, 928>}, {pipeline_mode = #tpu.pipeline_mode<synchronous>, transform_indices = @transform_4, window_bounds = array<i64: 928, 512>}, {pipeline_mode = #tpu.pipeline_mode<synchronous>, transform_indices = @transform_5, window_bounds = array<i64: 1, 512>}, {pipeline_mode = #tpu.pipeline_mode<synchronous>, transform_indices = @transform_6, window_bounds = array<i64: 512, 128>}, {pipeline_mode = #tpu.pipeline_mode<synchronous>, transform_indices = @transform_7, window_bounds = array<i64: 1, 128>}, {pipeline_mode = #tpu.pipeline_mode<synchronous>, transform_indices = @transform_8, window_bounds = array<i64: 1, 128>}, {pipeline_mode = #tpu.pipeline_mode<synchronous>, transform_indices = @transform_9, window_bounds = array<i64: 1, 1>}, {transform_indices = @transform_10, window_bounds = array<i64: 2, 1>}]} {
    %c0 = arith.constant 0 : index
    %c0_0 = arith.constant 0 : index
    %0 = vector.load %arg1[%c0, %c0_0] : memref<2x50xf32, #tpu.memory_space<vmem>>, vector<2x50xf32>
    %1 = arith.truncf %0 : vector<2x50xf32> to vector<2x50xbf16>
    %c0_1 = arith.constant 0 : index
    %c0_2 = arith.constant 0 : index
    %2 = vector.load %arg2[%c0_1, %c0_2] : memref<50x928xbf16, #tpu.memory_space<vmem>>, vector<50x928xbf16>
    %cst = arith.constant dense<0.000000e+00> : vector<2x928xf32>
    %3 = tpu.matmul %1, %2, %cst {dimension_numbers = #tpu.dot_dimension_numbers<[1], [0], [0], [1], [0, 0, 1, 1], [], []>} : vector<2x50xbf16>, vector<50x928xbf16>, vector<2x928xf32> -> vector<2x928xf32>
    %c0_3 = arith.constant 0 : index
    %c0_4 = arith.constant 0 : index
    %4 = vector.load %arg3[%c0_3, %c0_4] : memref<50x928xbf16, #tpu.memory_space<vmem>>, vector<50x928xbf16>
    %cst_5 = arith.constant dense<0.000000e+00> : vector<2x928xf32>
    %5 = tpu.matmul %1, %4, %cst_5 {dimension_numbers = #tpu.dot_dimension_numbers<[1], [0], [0], [1], [0, 0, 1, 1], [], []>} : vector<2x50xbf16>, vector<50x928xbf16>, vector<2x928xf32> -> vector<2x928xf32>
    %6 = arith.maximumf %3, %5 : vector<2x928xf32>
    %c0_6 = arith.constant 0 : index
    %c0_7 = arith.constant 0 : index
    %7 = vector.load %arg4[%c0_6, %c0_7] : memref<1x928xf32, #tpu.memory_space<vmem>>, vector<1x928xf32>
    %8 = vector.broadcast %7 : vector<1x928xf32> to vector<2x928xf32>
    %9 = arith.addf %6, %8 : vector<2x928xf32>
    %10 = math.tanh %9 : vector<2x928xf32>
    %11 = arith.truncf %10 : vector<2x928xf32> to vector<2x928xbf16>
    %c0_8 = arith.constant 0 : index
    %c0_9 = arith.constant 0 : index
    %12 = vector.load %arg5[%c0_8, %c0_9] : memref<928x512xbf16, #tpu.memory_space<vmem>>, vector<928x512xbf16>
    %cst_10 = arith.constant dense<0.000000e+00> : vector<2x512xf32>
    %13 = tpu.matmul %11, %12, %cst_10 {dimension_numbers = #tpu.dot_dimension_numbers<[1], [0], [0], [1], [0, 0, 1, 1], [], []>} : vector<2x928xbf16>, vector<928x512xbf16>, vector<2x512xf32> -> vector<2x512xf32>
    %c0_11 = arith.constant 0 : index
    %c0_12 = arith.constant 0 : index
    %14 = vector.load %arg6[%c0_11, %c0_12] : memref<1x512xf32, #tpu.memory_space<vmem>>, vector<1x512xf32>
    %15 = vector.broadcast %14 : vector<1x512xf32> to vector<2x512xf32>
    %16 = arith.addf %13, %15 : vector<2x512xf32>
    %17 = math.tanh %16 : vector<2x512xf32>
    %18 = arith.truncf %17 : vector<2x512xf32> to vector<2x512xbf16>
    %c0_13 = arith.constant 0 : index
    %c0_14 = arith.constant 0 : index
    %19 = vector.load %arg7[%c0_13, %c0_14] : memref<512x128xbf16, #tpu.memory_space<vmem>>, vector<512x128xbf16>
    %cst_15 = arith.constant dense<0.000000e+00> : vector<2x128xf32>
    %20 = tpu.matmul %18, %19, %cst_15 {dimension_numbers = #tpu.dot_dimension_numbers<[1], [0], [0], [1], [0, 0, 1, 1], [], []>} : vector<2x512xbf16>, vector<512x128xbf16>, vector<2x128xf32> -> vector<2x128xf32>
    %c0_16 = arith.constant 0 : index
    %c0_17 = arith.constant 0 : index
    %21 = vector.load %arg8[%c0_16, %c0_17] : memref<1x128xf32, #tpu.memory_space<vmem>>, vector<1x128xf32>
    %22 = vector.broadcast %21 : vector<1x128xf32> to vector<2x128xf32>
    %23 = arith.addf %20, %22 : vector<2x128xf32>
    %24 = math.tanh %23 : vector<2x128xf32>
    %c0_18 = arith.constant 0 : index
    %c0_19 = arith.constant 0 : index
    %25 = vector.load %arg9[%c0_18, %c0_19] : memref<1x128xf32, #tpu.memory_space<vmem>>, vector<1x128xf32>
    %26 = vector.broadcast %25 : vector<1x128xf32> to vector<2x128xf32>
    %27 = arith.mulf %24, %26 : vector<2x128xf32>
    %cst_20 = arith.constant dense<0.000000e+00> : vector<2xf32>
    %28 = vector.multi_reduction <add>, %27, %cst_20 [1] : vector<2x128xf32> to vector<2xf32>
    %29 = vector.shape_cast %28 : vector<2xf32> to vector<2x1xf32>
    %c0_21 = arith.constant 0 : index
    %c0_22 = arith.constant 0 : index
    %30 = vector.load %arg10[%c0_21, %c0_22] : memref<1x1xf32, #tpu.memory_space<vmem>>, vector<1x1xf32>
    %31 = vector.broadcast %30 : vector<1x1xf32> to vector<2x1xf32>
    %32 = arith.addf %29, %31 : vector<2x1xf32>
    %c0_23 = arith.constant 0 : index
    %c0_24 = arith.constant 0 : index
    %33 = vector.load %arg11[%c0_23, %c0_24] : memref<2x1xf32, #tpu.memory_space<vmem>>, vector<2x1xf32>
    tpu.vector_store %arg11[%c0_23, %c0_24], %32 {strides = array<i32>} : memref<2x1xf32, #tpu.memory_space<vmem>>, vector<2x1xf32>,
    return
  }
  func.func @transform_0(%arg0: i32) -> (i32, i32) {
    %c0_i32 = arith.constant 0 : i32
    %c0_i32_0 = arith.constant 0 : i32
    return %arg0, %c0_i32 : i32, i32
  }
  func.func @transform_1(%arg0: i32) -> (i32, i32) {
    %c0_i32 = arith.constant 0 : i32
    %c0_i32_0 = arith.constant 0 : i32
    %c0_i32_1 = arith.constant 0 : i32
    return %c0_i32, %c0_i32_0 : i32, i32
  }
  func.func @transform_2(%arg0: i32) -> (i32, i32) {
    %c0_i32 = arith.constant 0 : i32
    %c0_i32_0 = arith.constant 0 : i32
    %c0_i32_1 = arith.constant 0 : i32
    return %c0_i32, %c0_i32_0 : i32, i32
  }
  func.func @transform_3(%arg0: i32) -> (i32, i32) {
    %c0_i32 = arith.constant 0 : i32
    %c0_i32_0 = arith.constant 0 : i32
    %c0_i32_1 = arith.constant 0 : i32
    return %c0_i32, %c0_i32_0 : i32, i32
  }
  func.func @transform_4(%arg0: i32) -> (i32, i32) {
    %c0_i32 = arith.constant 0 : i32
    %c0_i32_0 = arith.constant 0 : i32
    %c0_i32_1 = arith.constant 0 : i32
    return %c0_i32, %c0_i32_0 : i32, i32
  }
  func.func @transform_5(%arg0: i32) -> (i32, i32) {
    %c0_i32 = arith.constant 0 : i32
    %c0_i32_0 = arith.constant 0 : i32
    %c0_i32_1 = arith.constant 0 : i32
    return %c0_i32, %c0_i32_0 : i32, i32
  }
  func.func @transform_6(%arg0: i32) -> (i32, i32) {
    %c0_i32 = arith.constant 0 : i32
    %c0_i32_0 = arith.constant 0 : i32
    %c0_i32_1 = arith.constant 0 : i32
    return %c0_i32, %c0_i32_0 : i32, i32
  }
  func.func @transform_7(%arg0: i32) -> (i32, i32) {
    %c0_i32 = arith.constant 0 : i32
    %c0_i32_0 = arith.constant 0 : i32
    %c0_i32_1 = arith.constant 0 : i32
    return %c0_i32, %c0_i32_0 : i32, i32
  }
  func.func @transform_8(%arg0: i32) -> (i32, i32) {
    %c0_i32 = arith.constant 0 : i32
    %c0_i32_0 = arith.constant 0 : i32
    %c0_i32_1 = arith.constant 0 : i32
    return %c0_i32, %c0_i32_0 : i32, i32
  }
  func.func @transform_9(%arg0: i32) -> (i32, i32) {
    %c0_i32 = arith.constant 0 : i32
    %c0_i32_0 = arith.constant 0 : i32
    %c0_i32_1 = arith.constant 0 : i32
    return %c0_i32, %c0_i32_0 : i32, i32
  }
  func.func @transform_10(%arg0: i32) -> (i32, i32) {
    %c0_i32 = arith.constant 0 : i32
    %c0_i32_0 = arith.constant 0 : i32
    return %arg0, %c0_i32 : i32, i32
  }
}

</mosaic_0001>

<bundles_post_ra>
// kernel: inception_forward.1
= control target key start
LH: loop header
LB: loop body
LE: loop exit
PB: predicated region body
PF: predicated region fallthrough
CT: control target
= control target key end

     0   :  { %s4224_s0 = inlined_call_operand.hbm [shape: f32[2,50], index: 0, kind: input, shape index: {}]   ;;  %s4225_s1 = inlined_call_operand.hbm [shape: bf16[50,928], index: 1, kind: input, shape index: {}]   ;;  %s4226_s2 = inlined_call_operand.hbm [shape: bf16[50,928], index: 2, kind: input, shape index: {}]   ;;  %s4227_s3 = inlined_call_operand.vmem [shape: f32[1,928], index: 3, kind: input, shape index: {}]   ;;  %s4228_s4 = inlined_call_operand.hbm [shape: bf16[928,512], index: 4, kind: input, shape index: {}]   ;;  %s4229_s5 = inlined_call_operand.hbm [shape: f32[1,512], index: 5, kind: input, shape index: {}]   ;;  %s4230_s6 = inlined_call_operand.hbm [shape: bf16[512,128], index: 6, kind: input, shape index: {}]   ;;  %s4231_s7 = inlined_call_operand.vmem [shape: f32[1,128], index: 7, kind: input, shape index: {}]   ;;  %s4232_s8 = inlined_call_operand.vmem [shape: f32[1,128], index: 8, kind: input, shape index: {}]   ;;  %s4233_s9 = inlined_call_operand.<no memory space> [shape: f32[1,1], index: 9, kind: input, shape index: {}]   ;;  %s4234_s10 = inlined_call_operand.vmem [shape: f32[2,1], index: 10, kind: output, shape index: {}]  }
   0x1   :  { %v15_v0 = vstv %s4233_s9 }
   0x2   :  { %16 = vst [vmem:[#allocation2] sm:$0x1] %v15_v0 }
   0x3   :  { %17 = vsyncpa [#allocation4], 0 }
   0x4   :  { %18 = vsyncpa [#allocation6], 0 }
   0x5   :  { %19 = vsyncpa [#allocation9], 0 }
   0x6   :  { %20 = vsyncpa [#allocation12], 0  ;;  %s3993_s15 = smov [#allocation5]  }
   0x7   :  { %s36_s16 = sshll.u32 %s3993_s15, 4  ;;  %s37_s16 = int_to_ptr.vmem [resolvable:$true] %s36_s16 }
   0x8   :  { %s3873_s17 = scalar_lea.vmem %s37_s16, 3584  ;;  %p3878_p1 = scmp.lt.s32.totalorder %s37_s16, %s37_s16 }
   0x9   :  { %p3874_p0 = scmp.ne.s32.totalorder %s37_s16, %s3873_s17  ;;  %p3879_p2 = scmp.lt.s32.totalorder %s3873_s17, %s3873_s17 }
   0xb   :  { %p3880_p3 = por %p3879_p2, %p3878_p1 }
   0xd   :  { %p3881_p4 = pnand %p3880_p3, %p3874_p0 }
   0xf   :  { %3884 = shalt.err (!%p3881_p4)
}
  0x10   :  { %s3994_s18 = smov 512   ;;  %s3995_s19 = smov 32  }
  0x11   :  { %42 = dma.hbm_to_vmem [thread:$0]  %s4225_s1, 3584, %s37_s16, [#allocation6], %s3994_s18, %s3994_s18, %s3995_s19  }
  0x12   :  { %s3996_s21 = smov [#allocation8]  }
  0x13   :  { %s62_s22 = sshll.u32 %s3996_s21, 4  ;;  %s63_s22 = int_to_ptr.vmem [resolvable:$true] %s62_s22 }
  0x14   :  { %s3893_s23 = scalar_lea.vmem %s63_s22, 29696  ;;  %p3898_p6 = scmp.lt.s32.totalorder %s63_s22, %s63_s22 }
  0x15   :  { %p3894_p5 = scmp.ne.s32.totalorder %s63_s22, %s3893_s23  ;;  %p3899_p7 = scmp.lt.s32.totalorder %s3893_s23, %s3893_s23 }
  0x17   :  { %p3900_p8 = por %p3899_p7, %p3898_p6 }
  0x19   :  { %p3901_p9 = pnand %p3900_p8, %p3894_p5 }
  0x1b   :  { %3904 = shalt.err (!%p3901_p9)
}
  0x1c   :  { %s3997_s24 = smov 256   ;;  %s3998_s25 = smov 16  }
  0x1d   :  { %68 = dma.hbm_to_vmem [thread:$0]  %s4228_s4, 29696, %s63_s22, [#allocation9], %s3997_s24, %s3997_s24, %s3998_s25  }
  0x1e   :  { %s3999_s28 = smov [#allocation3]   ;;  %s4000_s30 = smov [#allocation7]  }
  0x1f   :  { %s27_s29 = sshll.u32 %s3999_s28, 4  ;;  %s48_s1 = sshll.u32 %s4000_s30, 4  ;;  %s28_s29 = int_to_ptr.vmem [resolvable:$true] %s27_s29  ;;  %s49_s1 = int_to_ptr.vmem [resolvable:$true] %s48_s1 }
  0x20   :  { %s3913_s11 = scalar_lea.vmem %s28_s29, 32  ;;  %p3918_p11 = scmp.lt.s32.totalorder %s28_s29, %s28_s29 }
  0x21   :  { %p3914_p10 = scmp.ne.s32.totalorder %s28_s29, %s3913_s11  ;;  %p3919_p12 = scmp.lt.s32.totalorder %s3913_s11, %s3913_s11 }
  0x23   :  { %p3920_p13 = por %p3919_p12, %p3918_p11 }
  0x25   :  { %p3921_p0 = pnand %p3920_p13, %p3914_p10 }
  0x27   :  { %3924 = shalt.err (!%p3921_p0)
}
  0x28   :  { %30 = dma.hbm_to_vmem [thread:$0]  %s4224_s0, 32, %s28_s29, [#allocation4]  }
  0x29   :  { %s3933_s14 = scalar_lea.vmem %s49_s1, 3584  ;;  %p3938_p2 = scmp.lt.s32.totalorder %s49_s1, %s49_s1 }
  0x2a   :  { %p3934_p1 = scmp.ne.s32.totalorder %s49_s1, %s3933_s14  ;;  %p3939_p3 = scmp.lt.s32.totalorder %s3933_s14, %s3933_s14 }
  0x2c   :  { %p3940_p4 = por %p3939_p3, %p3938_p2 }
  0x2e   :  { %p3941_p5 = pnand %p3940_p4, %p3934_p1 }
  0x30   :  { %3944 = shalt.err (!%p3941_p5)
}
  0x31   :  { %54 = dma.hbm_to_vmem [thread:$0]  %s4226_s2, 3584, %s49_s1, [#allocation6], %s3994_s18, %s3994_s18, %s3995_s19  }
  0x32   :  { %s4001_s16 = smov [#allocation10]   ;;  %s4002_s9 = smov [#allocation11]  }
  0x33   :  { %s75_s17 = sshll.u32 %s4001_s16, 4  ;;  %s84_s20 = sshll.u32 %s4002_s9, 4  ;;  %s76_s17 = int_to_ptr.vmem [resolvable:$true] %s75_s17  ;;  %s85_s20 = int_to_ptr.vmem [resolvable:$true] %s84_s20 }
  0x34   :  { %s3953_s0 = scalar_lea.vmem %s76_s17, 64  ;;  %p3958_p7 = scmp.lt.s32.totalorder %s76_s17, %s76_s17 }
  0x35   :  { %p3954_p6 = scmp.ne.s32.totalorder %s76_s17, %s3953_s0  ;;  %p3959_p8 = scmp.lt.s32.totalorder %s3953_s0, %s3953_s0 }
  0x37   :  { %p3960_p9 = por %p3959_p8, %p3958_p7 }
  0x39   :  { %p3961_p10 = pnand %p3960_p9, %p3954_p6 }
  0x3b   :  { %3964 = shalt.err (!%p3961_p10)
}
  0x3c   :  { %78 = dma.hbm_to_vmem [thread:$0]  %s4229_s5, 64, %s76_s17, [#allocation9]  }
  0x3d   :  { %s3973_s23 = scalar_lea.vmem %s85_s20, 4096  ;;  %p3978_p12 = scmp.lt.s32.totalorder %s85_s20, %s85_s20 }
  0x3e   :  { %p3974_p11 = scmp.ne.s32.totalorder %s85_s20, %s3973_s23  ;;  %p3979_p13 = scmp.lt.s32.totalorder %s3973_s23, %s3973_s23 }
  0x40   :  { %p3980_p0 = por %p3979_p13, %p3978_p12 }
  0x42   :  { %p3981_p1 = pnand %p3980_p0, %p3974_p11 }
  0x44   :  { %3984 = shalt.err (!%p3981_p1)
}
  0x45   :  { %s4003_s2 = smov 64   ;;  %s4004_s18 = smov 4  }
  0x46   :  { %90 = dma.hbm_to_vmem [thread:$0]  %s4230_s6, 4096, %s85_s20, [#allocation12], %s4003_s2, %s4003_s2, %s4004_s18  }
  0x47   :  { %3985 = dma.done.wait [#allocation4], 32  }
  0x48   :  { %3986 = vsyncadd [#allocation4], 4294967264 }
  0x49   :  { %3987 = dma.done.wait [#allocation6], 7168  }
  0x4a   :  { %3988 = vsyncadd [#allocation6], 4294960128 }
  0x4b   :  { %3989 = dma.done.wait [#allocation9], 29760  }
  0x4c   :  { %3990 = vsyncadd [#allocation9], 4294937536 }
  0x4d   :  { %3991 = dma.done.wait [#allocation12], 4096  }
  0x4e   :  { %3992 = vsyncadd [#allocation12], 4294963200  ;;  %v4005_v1 = vmov 0   ;;  %v142_v2 = vld [vmem:[#allocation5 + $0xc0] sm:$0x11]  ;;  %vm290_vm0 = vcmask 1040384  }
  0x4f   :  { %347 = vmatprep.mubr.bf16.mxu0 %v4005_v1  ;;  %388 = vmatprep.mubr.bf16.mxu1 %v4005_v1  ;;  %v143_v3 = vld [vmem:[#allocation5 + $0xc8] sm:$0x11]  ;;  %v134_v4 = vld [vmem:[#allocation5 + $0x80] sm:$0xff]  ;;  %v3062_v5 = vcombine.high %v142_v2, %v142_v2  ;;  %v3061_v7 = vcombine.low %v142_v2, %v142_v2  ;;  %v144_v32 = vld [vmem:[#allocation5 + $0xd0] sm:$0x11]  ;;  %vm286_vm1 = vcmask 408576  }
  0x50   :  { %v3064_v6 = vcombine.high %v143_v3, %v143_v3  ;;  %v3063_v8 = vcombine.low %v143_v3, %v143_v3  ;;  %v138_v9 = vld [vmem:[#allocation5 + $0xa0] sm:$0xff]  ;;  %v135_v10 = vld [vmem:[#allocation5 + $0x88] sm:$0xff]  ;;  %v145_v33 = vld [vmem:[#allocation5 + $0xd8] sm:$0x11]  ;;  %v3066_v37 = vcombine.high %v144_v32, %v144_v32  ;;  %v3065_v39 = vcombine.low %v144_v32, %v144_v32 }
  0x51   :  { %v139_v11 = vld [vmem:[#allocation5 + $0xa8] sm:$0xff]  ;;  %v3054_v12 = vcombine.high %v134_v4, %v138_v9  ;;  %v126_v14 = vld [vmem:[#allocation5 + $0x40] sm:$0xff]  ;;  %3069 = vmatprep.subr.msk.bf16.mxu0 %vm290_vm0, %v3062_v5  ;;  %v292_v17 = vsel %vm290_vm0, %v3061_v7, 0  ;;  %v3053_v20 = vcombine.low %v134_v4, %v138_v9  ;;  %v116_v36 = vld [vmem:[#allocation3] sm:$0x3]  ;;  %v3068_v38 = vcombine.high %v145_v33, %v145_v33 }
  0x52   :  { %v3056_v13 = vcombine.high %v135_v10, %v139_v11  ;;  %v130_v15 = vld [vmem:[#allocation5 + $0x60] sm:$0xff]  ;;  %v127_v16 = vld [vmem:[#allocation5 + $0x48] sm:$0xff]  ;;  %3071 = vmatprep.subr.msk.bf16.mxu1 %vm290_vm0, %v3064_v6  ;;  %v298_v18 = vsel %vm290_vm0, %v3063_v8, 0  ;;  %324 = vmatpush1.bf16.msra.mxu0 %v292_v17  ;;  %v3055_v21 = vcombine.low %v135_v10, %v139_v11  ;;  %v3067_v40 = vcombine.low %v145_v33, %v145_v33  ;;  %v136_v41 = vld [vmem:[#allocation5 + $0x90] sm:$0xff] }
  0x53   :  { %v131_v19 = vld [vmem:[#allocation5 + $0x68] sm:$0xff]  ;;  %365 = vmatpush1.bf16.msra.mxu1 %v298_v18  ;;  %325 = vmatprep.subr.bf16.mxu0 %v3054_v12  ;;  %v3046_v22 = vcombine.high %v126_v14, %v130_v15  ;;  %v118_v24 = vld [vmem:[#allocation5] sm:$0xff]  ;;  %v3045_v28 = vcombine.low %v126_v14, %v130_v15  ;;  %v140_v42 = vld [vmem:[#allocation5 + $0xb0] sm:$0xff]  ;;  %v4094_v45 = vpack.c.bf16 %v116_v36, %v116_v36  ;;  %v304_v46 = vsel %vm290_vm0, %v3065_v39, 0 }
  0x54   :  { %366 = vmatprep.subr.bf16.mxu1 %v3056_v13  ;;  %v3048_v23 = vcombine.high %v127_v16, %v131_v19  ;;  %v122_v25 = vld [vmem:[#allocation5 + $0x20] sm:$0xff]  ;;  %v119_v26 = vld [vmem:[#allocation5 + $0x8] sm:$0xff]  ;;  %v3047_v29 = vcombine.low %v127_v16, %v131_v19  ;;  %v137_v43 = vld [vmem:[#allocation5 + $0x98] sm:$0xff]  ;;  %v310_v47 = vsel %vm290_vm0, %v3067_v40, 0  ;;  %v3058_v48 = vcombine.high %v136_v41, %v140_v42 }
  0x55   :  { %v123_v27 = vld [vmem:[#allocation5 + $0x28] sm:$0xff]  ;;  %v3038_v30 = vcombine.high %v118_v24, %v122_v25  ;;  %v3037_v34 = vcombine.low %v118_v24, %v122_v25  ;;  %v141_v44 = vld [vmem:[#allocation5 + $0xb8] sm:$0xff]  ;;  %v128_v50 = vld [vmem:[#allocation5 + $0x50] sm:$0xff]  ;;  %v3057_v54 = vcombine.low %v136_v41, %v140_v42  ;;  %vm2323_vm2 = vcmask 261120  }
  0x56   :  { %326 = vmatpush1.bf16.msra.mxu0 %v3053_v20  ;;  %v3040_v31 = vcombine.high %v119_v26, %v123_v27  ;;  %v3039_v35 = vcombine.low %v119_v26, %v123_v27  ;;  %v3060_v49 = vcombine.high %v137_v43, %v141_v44  ;;  %v132_v51 = vld [vmem:[#allocation5 + $0x70] sm:$0xff]  ;;  %v129_v52 = vld [vmem:[#allocation5 + $0x58] sm:$0xff]  ;;  %v3059_v55 = vcombine.low %v137_v43, %v141_v44  ;;  %v503_v3 = vld [vmem:[#allocation7 + $0xc0] sm:$0x11] }
  0x57   :  { %367 = vmatpush1.bf16.msra.mxu1 %v3055_v21  ;;  %327 = vmatprep.subr.bf16.mxu0 %v3046_v22  ;;  %v133_v53 = vld [vmem:[#allocation5 + $0x78] sm:$0xff]  ;;  %v3050_v56 = vcombine.high %v128_v50, %v132_v51  ;;  %v120_v58 = vld [vmem:[#allocation5 + $0x10] sm:$0xff]  ;;  %v3049_v62 = vcombine.low %v128_v50, %v132_v51  ;;  %v504_v4 = vld [vmem:[#allocation7 + $0xc8] sm:$0x11]  ;;  %v3102_v7 = vcombine.high %v503_v3, %v503_v3  ;;  %vm3015_vm3 = vcmask 1041408  }
  0x58   :  { %368 = vmatprep.subr.bf16.mxu1 %v3048_v23  ;;  %v3052_v57 = vcombine.high %v129_v52, %v133_v53  ;;  %v124_v59 = vld [vmem:[#allocation5 + $0x30] sm:$0xff]  ;;  %v121_v60 = vld [vmem:[#allocation5 + $0x18] sm:$0xff]  ;;  %v3051_v63 = vcombine.low %v129_v52, %v133_v53  ;;  %v495_v8 = vld [vmem:[#allocation7 + $0x80] sm:$0xff]  ;;  %v3104_v12 = vcombine.high %v504_v4, %v504_v4  ;;  %v3101_v13 = vcombine.low %v503_v3, %v503_v3 }
  0x59   :  { %v125_v61 = vld [vmem:[#allocation5 + $0x38] sm:$0xff]  ;;  %v3042_v0 = vcombine.high %v120_v58, %v124_v59  ;;  %v3041_v5 = vcombine.low %v120_v58, %v124_v59  ;;  %v499_v9 = vld [vmem:[#allocation7 + $0xa0] sm:$0xff]  ;;  %v496_v10 = vld [vmem:[#allocation7 + $0x88] sm:$0xff]  ;;  %v3103_v14 = vcombine.low %v504_v4, %v504_v4  ;;  %vm3027_vm4 = vcmask 1024  }
  0x5a   :  { %328 = vmatpush1.bf16.msra.mxu0 %v3045_v28  ;;  %v3044_v2 = vcombine.high %v121_v60, %v125_v61  ;;  %v3043_v6 = vcombine.low %v121_v60, %v125_v61  ;;  %v500_v11 = vld [vmem:[#allocation7 + $0xa8] sm:$0xff]  ;;  %v487_v15 = vld [vmem:[#allocation7 + $0x40] sm:$0xff]  ;;  %v648_v19 = vsel %vm290_vm0, %v3101_v13, 0  ;;  %v3094_v21 = vcombine.high %v495_v8, %v499_v9  ;;  %v497_v40 = vld [vmem:[#allocation7 + $0x90] sm:$0xff] }
  0x5b   :  { %369 = vmatpush1.bf16.msra.mxu1 %v3047_v29  ;;  %329 = vmatprep.subr.bf16.mxu0 %v3038_v30  ;;  %v491_v16 = vld [vmem:[#allocation7 + $0x60] sm:$0xff]  ;;  %v488_v17 = vld [vmem:[#allocation7 + $0x48] sm:$0xff]  ;;  %v654_v20 = vsel %vm290_vm0, %v3103_v14, 0  ;;  %v3096_v22 = vcombine.high %v496_v10, %v500_v11  ;;  %v3093_v23 = vcombine.low %v495_v8, %v499_v9  ;;  %v3095_v24 = vcombine.low %v496_v10, %v500_v11  ;;  %v501_v41 = vld [vmem:[#allocation7 + $0xb0] sm:$0xff] }
  0x5c   :  { %370 = vmatprep.subr.bf16.mxu1 %v3040_v31  ;;  %v492_v18 = vld [vmem:[#allocation7 + $0x68] sm:$0xff]  ;;  %v479_v25 = vld [vmem:[#allocation7] sm:$0xff]  ;;  %v3086_v29 = vcombine.high %v487_v15, %v491_v16  ;;  %v505_v31 = vld [vmem:[#allocation7 + $0xd0] sm:$0x11]  ;;  %v3085_v32 = vcombine.low %v487_v15, %v491_v16 }
  0x5d   :  { %v483_v26 = vld [vmem:[#allocation7 + $0x20] sm:$0xff]  ;;  %v480_v27 = vld [vmem:[#allocation7 + $0x8] sm:$0xff]  ;;  %v3088_v30 = vcombine.high %v488_v17, %v492_v18  ;;  %v3087_v33 = vcombine.low %v488_v17, %v492_v18  ;;  %v3106_v39 = vcombine.high %v505_v31, %v505_v31  ;;  %v498_v42 = vld [vmem:[#allocation7 + $0x98] sm:$0xff] }
  0x5e   :  { %330 = vmatpush1.bf16.msra.mxu0 %v3037_v34  ;;  %v484_v28 = vld [vmem:[#allocation7 + $0x28] sm:$0xff]  ;;  %v506_v34 = vld [vmem:[#allocation7 + $0xd8] sm:$0x11]  ;;  %v481_v58 = vld [vmem:[#allocation7 + $0x10] sm:$0xff] }
  0x5f   :  { %371 = vmatpush1.bf16.msra.mxu1 %v3039_v35  ;;  %3073 = vmatprep.subr.msk.bf16.mxu0 %vm290_vm0, %v3066_v37  ;;  %v3078_v35 = vcombine.high %v479_v25, %v483_v26  ;;  %v3080_v36 = vcombine.high %v480_v27, %v484_v28  ;;  %v3077_v37 = vcombine.low %v479_v25, %v483_v26  ;;  %v502_v43 = vld [vmem:[#allocation7 + $0xb8] sm:$0xff]  ;;  %v485_v59 = vld [vmem:[#allocation7 + $0x30] sm:$0xff] }
  0x60   :  { %3075 = vmatprep.subr.msk.bf16.mxu1 %vm290_vm0, %v3068_v38  ;;  %v3079_v38 = vcombine.low %v480_v27, %v484_v28  ;;  %v3108_v44 = vcombine.high %v506_v34, %v506_v34  ;;  %v490_v50 = vld [vmem:[#allocation7 + $0x58] sm:$0xff]  ;;  %v3082_v3 = vcombine.high %v481_v58, %v485_v59  ;;  %v3459_v9 = vld [vmem:[#allocation8 + $0xe0] ss:$16 sps:$4 sm:$0xff]   ;;  %v3467_v11 = vld [vmem:[#allocation8 + $0xc4] ss:$16 sps:$4 sm:$0xff]  }
  0x61   :  { %3070 = vmatmul.mubr.msk.bf16.vlgmr.msra.gmra.mxu0 %vm286_vm1, %v4094_v45  ;;  %v494_v51 = vld [vmem:[#allocation7 + $0x78] sm:$0xff]  ;;  %v3462_v10 = vld [vmem:[#allocation8 + $0x2e0] ss:$16 sps:$4 sm:$0xff]   ;;  %v3473_v14 = vld [vmem:[#allocation8 + $0xa4] ss:$16 sps:$4 sm:$0xff]  }
  0x62   :  { %3072 = vmatmul.mubr.msk.bf16.vlgmr.msra.gmra.mxu1 %vm286_vm1, %v4094_v45  ;;  %406 = vmatpush1.bf16.msra.mxu0 %v304_v46  ;;  %v3105_v46 = vcombine.low %v505_v31, %v505_v31  ;;  %v482_v60 = vld [vmem:[#allocation7 + $0x18] sm:$0xff]  ;;  %v3468_v13 = vld [vmem:[#allocation8 + $0x2c0] ss:$16 sps:$4 sm:$0xff]   ;;  %v3476_v15 = vld [vmem:[#allocation8 + $0x2a4] ss:$16 sps:$4 sm:$0xff]  }
  0x63   :  { %447 = vmatpush1.bf16.msra.mxu1 %v310_v47  ;;  %407 = vmatprep.subr.bf16.mxu0 %v3058_v48  ;;  %v3107_v47 = vcombine.low %v506_v34, %v506_v34  ;;  %v489_v48 = vld [vmem:[#allocation7 + $0x50] sm:$0xff]  ;;  %v486_v61 = vld [vmem:[#allocation7 + $0x38] sm:$0xff] }
  0x64   :  { %448 = vmatprep.subr.bf16.mxu1 %v3060_v49  ;;  %429 = vmatprep.mubr.bf16.mxu0 %v4005_v1  ;;  %v493_v49 = vld [vmem:[#allocation7 + $0x70] sm:$0xff]  ;;  %v660_v52 = vsel %vm290_vm0, %v3105_v46, 0  ;;  %v3084_v4 = vcombine.high %v482_v60, %v486_v61  ;;  %v3083_v8 = vcombine.low %v482_v60, %v486_v61 }
  0x65   :  { %470 = vmatprep.mubr.bf16.mxu1 %v4005_v1  ;;  %v666_v53 = vsel %vm290_vm0, %v3107_v47, 0  ;;  %v3471_v16 = vld [vmem:[#allocation8 + $0xa0] ss:$16 sps:$4 sm:$0xff]   ;;  %v3479_v18 = vld [vmem:[#allocation8 + $0x84] ss:$16 sps:$4 sm:$0xff]  }
  0x66   :  { %408 = vmatpush1.bf16.msra.mxu0 %v3057_v54  ;;  %v3098_v54 = vcombine.high %v497_v40, %v501_v41  ;;  %v3474_v17 = vld [vmem:[#allocation8 + $0x2a0] ss:$16 sps:$4 sm:$0xff]   ;;  %v3491_v25 = vld [vmem:[#allocation8 + $0x44] ss:$16 sps:$4 sm:$0xff]  }
  0x67   :  { %449 = vmatpush1.bf16.msra.mxu1 %v3059_v55  ;;  %409 = vmatprep.subr.bf16.mxu0 %v3050_v56  ;;  %v3100_v55 = vcombine.high %v498_v42, %v502_v43  ;;  %v3097_v56 = vcombine.low %v497_v40, %v501_v41  ;;  %v3494_v26 = vld [vmem:[#allocation8 + $0x244] ss:$16 sps:$4 sm:$0xff]   ;;  %v3489_v27 = vld [vmem:[#allocation8 + $0x40] ss:$16 sps:$4 sm:$0xff]  }
  0x68   :  { %450 = vmatprep.subr.bf16.mxu1 %v3052_v57  ;;  %v3099_v57 = vcombine.low %v498_v42, %v502_v43  ;;  %v3492_v28 = vld [vmem:[#allocation8 + $0x240] ss:$16 sps:$4 sm:$0xff]   ;;  %v3506_v34 = vld [vmem:[#allocation8 + $0x204] ss:$16 sps:$4 sm:$0xff]  }
  0x69   :  { %v3495_v31 = vld [vmem:[#allocation8 + $0x20] ss:$16 sps:$4 sm:$0xff]   ;;  %v3515_v41 = vld [vmem:[#allocation8 + $0x1c4] ss:$16 sps:$4 sm:$0xff]  }
  0x6a   :  { %410 = vmatpush1.bf16.msra.mxu0 %v3049_v62  ;;  %v3090_v62 = vcombine.high %v489_v48, %v493_v49  ;;  %v3510_v40 = vld [vmem:[#allocation8 + $0x3e0] ss:$16 sps:$4 sm:$0xff]   ;;  %v3518_v42 = vld [vmem:[#allocation8 + $0x3c4] ss:$16 sps:$4 sm:$0xff]  }
  0x6b   :  { %451 = vmatpush1.bf16.msra.mxu1 %v3051_v63  ;;  %411 = vmatprep.subr.bf16.mxu0 %v3042_v0  ;;  %v3092_v63 = vcombine.high %v490_v50, %v494_v51  ;;  %v3089_v0 = vcombine.low %v489_v48, %v493_v49  ;;  %v3513_v43 = vld [vmem:[#allocation8 + $0x1c0] ss:$16 sps:$4 sm:$0xff]   ;;  %v3521_v46 = vld [vmem:[#allocation8 + $0x1a4] ss:$16 sps:$4 sm:$0xff]  }
  0x6c   :  { %452 = vmatprep.subr.bf16.mxu1 %v3044_v2  ;;  %v3091_v2 = vcombine.low %v490_v50, %v494_v51  ;;  %v3524_v47 = vld [vmem:[#allocation8 + $0x3a4] ss:$16 sps:$4 sm:$0xff]   ;;  %v3519_v48 = vld [vmem:[#allocation8 + $0x1a0] ss:$16 sps:$4 sm:$0xff]   ;;  %v845_v50 = vlaneseq }
  0x6d   :  { %v3522_v49 = vld [vmem:[#allocation8 + $0x3a0] ss:$16 sps:$4 sm:$0xff]   ;;  %v3539_v60 = vld [vmem:[#allocation8 + $0x144] ss:$16 sps:$4 sm:$0xff]  }
  0x6e   :  { %412 = vmatpush1.bf16.msra.mxu0 %v3041_v5  ;;  %v3461_v5 = vld [vmem:[#allocation8 + $0xe4] ss:$16 sps:$4 sm:$0xff]   ;;  %v4130_v51 = vshrl.u32 %v845_v50, 7 }
  0x6f   :  { %453 = vmatpush1.bf16.msra.mxu1 %v3043_v6  ;;  %3109 = vmatprep.subr.msk.bf16.mxu0 %vm290_vm0, %v3102_v7  ;;  %v3464_v6 = vld [vmem:[#allocation8 + $0x2e4] ss:$16 sps:$4 sm:$0xff]   ;;  %v3081_v7 = vcombine.low %v481_v58, %v485_v59  ;;  %v3531_v58 = vld [vmem:[#allocation8 + $0x160] ss:$16 sps:$4 sm:$0xff]  }
  0x70   :  { %3111 = vmatprep.subr.msk.bf16.mxu1 %vm290_vm0, %v3104_v12  ;;  %v3465_v12 = vld [vmem:[#allocation8 + $0xc0] ss:$16 sps:$4 sm:$0xff]   ;;  %v3542_v61 = vld [vmem:[#allocation8 + $0x344] ss:$16 sps:$4 sm:$0xff]  }
  0x71   :  { %3074 = vmatmul.mubr.msk.bf16.vlgmr.msra.gmra.mxu0 %vm286_vm1, %v4094_v45  ;;  %v3534_v59 = vld [vmem:[#allocation8 + $0x360] ss:$16 sps:$4 sm:$0xff]  }
  0x72   :  { %3076 = vmatmul.mubr.msk.bf16.vlgmr.msra.gmra.mxu1 %vm286_vm1, %v4094_v45  ;;  %680 = vmatpush1.bf16.msra.mxu0 %v648_v19  ;;  %v3482_v19 = vld [vmem:[#allocation8 + $0x284] ss:$16 sps:$4 sm:$0xff]  }
  0x73   :  { %721 = vmatpush1.bf16.msra.mxu1 %v654_v20  ;;  %681 = vmatprep.subr.bf16.mxu0 %v3094_v21  ;;  %v3477_v20 = vld [vmem:[#allocation8 + $0x80] ss:$16 sps:$4 sm:$0xff]  }
  0x74   :  { %722 = vmatprep.subr.bf16.mxu1 %v3096_v22  ;;  %703 = vmatprep.mubr.bf16.mxu0 %v4005_v1  ;;  %v3480_v21 = vld [vmem:[#allocation8 + $0x280] ss:$16 sps:$4 sm:$0xff]   ;;  %v3488_v22 = vld [vmem:[#allocation8 + $0x264] ss:$16 sps:$4 sm:$0xff]  }
  0x75   :  { %744 = vmatprep.mubr.bf16.mxu1 %v4005_v1 }
  0x76   :  { %682 = vmatpush1.bf16.msra.mxu0 %v3093_v23  ;;  %v3483_v23 = vld [vmem:[#allocation8 + $0x60] ss:$16 sps:$4 sm:$0xff]  }
  0x77   :  { %723 = vmatpush1.bf16.msra.mxu1 %v3095_v24  ;;  %683 = vmatprep.subr.bf16.mxu0 %v3086_v29  ;;  %v3486_v24 = vld [vmem:[#allocation8 + $0x260] ss:$16 sps:$4 sm:$0xff]   ;;  %v3497_v29 = vld [vmem:[#allocation8 + $0x24] ss:$16 sps:$4 sm:$0xff]  }
  0x78   :  { %724 = vmatprep.subr.bf16.mxu1 %v3088_v30  ;;  %v3500_v30 = vld [vmem:[#allocation8 + $0x224] ss:$16 sps:$4 sm:$0xff]  }
  0x7a   :  { %684 = vmatpush1.bf16.msra.mxu0 %v3085_v32  ;;  %v3498_v32 = vld [vmem:[#allocation8 + $0x220] ss:$16 sps:$4 sm:$0xff]  }
  0x7b   :  { %725 = vmatpush1.bf16.msra.mxu1 %v3087_v33  ;;  %685 = vmatprep.subr.bf16.mxu0 %v3078_v35  ;;  %v3503_v33 = vld [vmem:[#allocation8 + $0x4] ss:$16 sps:$4 sm:$0xff]   ;;  %v3501_v35 = vld [vmem:[#allocation8] ss:$16 sps:$4 sm:$0xff]  }
  0x7c   :  { %726 = vmatprep.subr.bf16.mxu1 %v3080_v36  ;;  %v3504_v36 = vld [vmem:[#allocation8 + $0x200] ss:$16 sps:$4 sm:$0xff]  }
  0x7e   :  { %686 = vmatpush1.bf16.msra.mxu0 %v3077_v37  ;;  %v3509_v37 = vld [vmem:[#allocation8 + $0x1e4] ss:$16 sps:$4 sm:$0xff]  }
  0x7f   :  { %727 = vmatpush1.bf16.msra.mxu1 %v3079_v38  ;;  %3113 = vmatprep.subr.msk.bf16.mxu0 %vm290_vm0, %v3106_v39  ;;  %v3512_v38 = vld [vmem:[#allocation8 + $0x3e4] ss:$16 sps:$4 sm:$0xff]   ;;  %v3507_v39 = vld [vmem:[#allocation8 + $0x1e0] ss:$16 sps:$4 sm:$0xff]  }
  0x80   :  { %3115 = vmatprep.subr.msk.bf16.mxu1 %vm290_vm0, %v3108_v44  ;;  %v3516_v44 = vld [vmem:[#allocation8 + $0x3c0] ss:$16 sps:$4 sm:$0xff]  }
  0x81   :  { %3110 = vmatmul.mubr.msk.bf16.vlgmr.msra.gmra.mxu0 %vm286_vm1, %v4094_v45 }
  0x82   :  { %3112 = vmatmul.mubr.msk.bf16.vlgmr.msra.gmra.mxu1 %vm286_vm1, %v4094_v45  ;;  %762 = vmatpush1.bf16.msra.mxu0 %v660_v52  ;;  %v3527_v52 = vld [vmem:[#allocation8 + $0x184] ss:$16 sps:$4 sm:$0xff]  }
  0x83   :  { %803 = vmatpush1.bf16.msra.mxu1 %v666_v53  ;;  %763 = vmatprep.subr.bf16.mxu0 %v3098_v54  ;;  %v3530_v53 = vld [vmem:[#allocation8 + $0x384] ss:$16 sps:$4 sm:$0xff]   ;;  %v3525_v54 = vld [vmem:[#allocation8 + $0x180] ss:$16 sps:$4 sm:$0xff]  }
  0x84   :  { %804 = vmatprep.subr.bf16.mxu1 %v3100_v55  ;;  %785 = vmatprep.mubr.bf16.mxu0 %v4005_v1  ;;  %v3528_v55 = vld [vmem:[#allocation8 + $0x380] ss:$16 sps:$4 sm:$0xff]  }
  0x85   :  { %826 = vmatprep.mubr.bf16.mxu1 %v4005_v1  ;;  %v3470_v1 = vld [vmem:[#allocation8 + $0x2c4] ss:$16 sps:$4 sm:$0xff]  }
  0x86   :  { %764 = vmatpush1.bf16.msra.mxu0 %v3097_v56  ;;  %v3533_v56 = vld [vmem:[#allocation8 + $0x164] ss:$16 sps:$4 sm:$0xff]  }
  0x87   :  { %805 = vmatpush1.bf16.msra.mxu1 %v3099_v57  ;;  %765 = vmatprep.subr.bf16.mxu0 %v3090_v62  ;;  %v3536_v57 = vld [vmem:[#allocation8 + $0x364] ss:$16 sps:$4 sm:$0xff]   ;;  %v3537_v62 = vld [vmem:[#allocation8 + $0x140] ss:$16 sps:$4 sm:$0xff]  }
  0x88   :  { %806 = vmatprep.subr.bf16.mxu1 %v3092_v63  ;;  %v3540_v63 = vld [vmem:[#allocation8 + $0x340] ss:$16 sps:$4 sm:$0xff]  }
  0x8a   :  { %766 = vmatpush1.bf16.msra.mxu0 %v3089_v0  ;;  %v3545_v0 = vld [vmem:[#allocation8 + $0x124] ss:$16 sps:$4 sm:$0xff]  }
  0x8b   :  { %807 = vmatpush1.bf16.msra.mxu1 %v3091_v2  ;;  %767 = vmatprep.subr.bf16.mxu0 %v3082_v3  ;;  %v3548_v2 = vld [vmem:[#allocation8 + $0x324] ss:$16 sps:$4 sm:$0xff]   ;;  %v3543_v3 = vld [vmem:[#allocation8 + $0x120] ss:$16 sps:$4 sm:$0xff]  }
  0x8c   :  { %808 = vmatprep.subr.bf16.mxu1 %v3084_v4  ;;  %v3546_v4 = vld [vmem:[#allocation8 + $0x320] ss:$16 sps:$4 sm:$0xff]  }
  0x8e   :  { %768 = vmatpush1.bf16.msra.mxu0 %v3081_v7 }
  0x8f   :  { %809 = vmatpush1.bf16.msra.mxu1 %v3083_v8  ;;  %2327 = vmatprep.subr.bf16.mxu0 %v3461_v5  ;;  %v4135_v5 = vld [vmem:[%s4227_s3] sm:$0xff] }
  0x90   :  { %2368 = vmatprep.subr.bf16.mxu1 %v3464_v6  ;;  %v863_v6 = vsub.s32 4, %v4130_v51  ;;  %v3551_v8 = vld [vmem:[#allocation8 + $0x104] ss:$16 sps:$4 sm:$0xff]  }
  0x91   :  { %3114 = vmatmul.mubr.msk.bf16.vlgmr.msra.gmra.mxu0 %vm286_vm1, %v4094_v45 }
  0x92   :  { %3116 = vmatmul.mubr.msk.bf16.vlgmr.msra.gmra.mxu1 %vm286_vm1, %v4094_v45  ;;  %2328 = vmatpush1.bf16.msra.mxu0 %v3459_v9  ;;  %v3485_v45 = vld [vmem:[#allocation8 + $0x64] ss:$16 sps:$4 sm:$0xff]   ;;  %v4139_v7 = vrot.slane %v4135_v5, %v863_v6 }
  0x93   :  { %2369 = vmatpush1.bf16.msra.mxu1 %v3462_v10  ;;  %2329 = vmatprep.subr.bf16.mxu0 %v3467_v11  ;;  %v3554_v9 = vld [vmem:[#allocation8 + $0x304] ss:$16 sps:$4 sm:$0xff]   ;;  %v3549_v10 = vld [vmem:[#allocation8 + $0x100] ss:$16 sps:$4 sm:$0xff]  }
  0x94   :  { %2370 = vmatprep.subr.bf16.mxu1 %v3470_v1  ;;  %v3552_v11 = vld [vmem:[#allocation8 + $0x300] ss:$16 sps:$4 sm:$0xff]   ;;  %v3557_v1 = vld [vmem:[#allocation8 + $0x4e4] ss:$16 sps:$4 sm:$0xff]  }
  0x96   :  { %2330 = vmatpush1.bf16.msra.mxu0 %v3465_v12  ;;  %v3560_v12 = vld [vmem:[#allocation8 + $0x6e4] ss:$16 sps:$4 sm:$0xff]  }
  0x97   :  { %2371 = vmatpush1.bf16.msra.mxu1 %v3468_v13  ;;  %2331 = vmatprep.subr.bf16.mxu0 %v3473_v14 }
  0x98   :  { %2372 = vmatprep.subr.bf16.mxu1 %v3476_v15 }
  0x9a   :  { %2332 = vmatpush1.bf16.msra.mxu0 %v3471_v16 }
  0x9b   :  { %2373 = vmatpush1.bf16.msra.mxu1 %v3474_v17  ;;  %2333 = vmatprep.subr.bf16.mxu0 %v3479_v18 }
  0x9c   :  { %2374 = vmatprep.subr.bf16.mxu1 %v3482_v19 }
  0x9e   :  { %2334 = vmatpush1.bf16.msra.mxu0 %v3477_v20 }
  0x9f   :  { %2375 = vmatpush1.bf16.msra.mxu1 %v3480_v21  ;;  %2335 = vmatprep.subr.bf16.mxu0 %v3485_v45 }
  0xa0   :  { %2376 = vmatprep.subr.bf16.mxu1 %v3488_v22 }
  0xa2   :  { %2336 = vmatpush1.bf16.msra.mxu0 %v3483_v23 }
  0xa3   :  { %2377 = vmatpush1.bf16.msra.mxu1 %v3486_v24  ;;  %2337 = vmatprep.subr.bf16.mxu0 %v3491_v25 }
  0xa4   :  { %2378 = vmatprep.subr.bf16.mxu1 %v3494_v26 }
  0xa6   :  { %2338 = vmatpush1.bf16.msra.mxu0 %v3489_v27 }
  0xa7   :  { %2379 = vmatpush1.bf16.msra.mxu1 %v3492_v28  ;;  %2339 = vmatprep.subr.bf16.mxu0 %v3497_v29  ;;  %v847_v28 = vsub.s32 0, %v4130_v51  ;;  %v855_v29 = vsub.s32 2, %v4130_v51 }
  0xa8   :  { %2380 = vmatprep.subr.bf16.mxu1 %v3500_v30  ;;  %v851_v30 = vsub.s32 1, %v4130_v51 }
  0xaa   :  { %2340 = vmatpush1.bf16.msra.mxu0 %v3495_v31  ;;  %v859_v31 = vsub.s32 3, %v4130_v51 }
  0xab   :  { %2381 = vmatpush1.bf16.msra.mxu1 %v3498_v32  ;;  %2341 = vmatprep.subr.bf16.mxu0 %v3503_v33  ;;  %v848_v32 = vrot.slane %v4135_v5, %v847_v28  ;;  %v856_v33 = vrot.slane %v4135_v5, %v855_v29 }
  0xac   :  { %2382 = vmatprep.subr.bf16.mxu1 %v3506_v34 }
  0xae   :  { %2342 = vmatpush1.bf16.msra.mxu0 %v3501_v35 }
  0xaf   :  { %2383 = vmatpush1.bf16.msra.mxu1 %v3504_v36  ;;  %2343 = vmatprep.subr.bf16.mxu0 %v3509_v37 }
  0xb0   :  { %2384 = vmatprep.subr.bf16.mxu1 %v3512_v38  ;;  %v852_v38 = vrot.slane %v4135_v5, %v851_v30 }
  0xb2   :  { %2344 = vmatpush2.bf16.msra.mxu0 %v3507_v39  ;;  %v860_v39 = vrot.slane %v4135_v5, %v859_v31 }
  0xb3   :  { %2385 = vmatpush2.bf16.msra.mxu1 %v3510_v40  ;;  %2345 = vmatprep.subr.bf16.mxu0 %v3515_v41 }
  0xb4   :  { %2386 = vmatprep.subr.bf16.mxu1 %v3518_v42 }
  0xb6   :  { %2346 = vmatpush2.bf16.msra.mxu0 %v3513_v43 }
  0xb7   :  { %2387 = vmatpush2.bf16.msra.mxu1 %v3516_v44  ;;  %2347 = vmatprep.subr.bf16.mxu0 %v3521_v46 }
  0xb8   :  { %2388 = vmatprep.subr.bf16.mxu1 %v3524_v47 }
  0xba   :  { %2348 = vmatpush2.bf16.msra.mxu0 %v3519_v48 }
  0xbb   :  { %2389 = vmatpush2.bf16.msra.mxu1 %v3522_v49  ;;  %2349 = vmatprep.subr.bf16.mxu0 %v3527_v52 }
  0xbc   :  { %2390 = vmatprep.subr.bf16.mxu1 %v3530_v53 }
  0xbe   :  { %2350 = vmatpush2.bf16.msra.mxu0 %v3525_v54  ;;  %v867_v54 = vsub.s32 5, %v4130_v51 }
  0xbf   :  { %2391 = vmatpush2.bf16.msra.mxu1 %v3528_v55  ;;  %2351 = vmatprep.subr.bf16.mxu0 %v3533_v56  ;;  %v875_v55 = vsub.s32 7, %v4130_v51 }
  0xc0   :  { %2392 = vmatprep.subr.bf16.mxu1 %v3536_v57 }
  0xc2   :  { %2352 = vmatpush2.bf16.msra.mxu0 %v3531_v58 }
  0xc3   :  { %2393 = vmatpush2.bf16.msra.mxu1 %v3534_v59  ;;  %2353 = vmatprep.subr.bf16.mxu0 %v3539_v60  ;;  %v868_v59 = vrot.slane %v4135_v5, %v867_v54  ;;  %v3596_v54 = vld [vmem:[#allocation8 + $0x624] ss:$16 sps:$4 sm:$0xff]  }
  0xc4   :  { %2394 = vmatprep.subr.bf16.mxu1 %v3542_v61 }
  0xc6   :  { %2354 = vmatpush2.bf16.msra.mxu0 %v3537_v62 }
  0xc7   :  { %2395 = vmatpush2.bf16.msra.mxu1 %v3540_v63  ;;  %2355 = vmatprep.subr.bf16.mxu0 %v3545_v0  ;;  %v876_v63 = vrot.slane %v4135_v5, %v875_v55  ;;  %v3599_v55 = vld [vmem:[#allocation8 + $0x404] ss:$16 sps:$4 sm:$0xff]  }
  0xc8   :  { %2396 = vmatprep.subr.bf16.mxu1 %v3548_v2 }
  0xca   :  { %2356 = vmatpush2.bf16.msra.mxu0 %v3543_v3 }
  0xcb   :  { %2397 = vmatpush2.bf16.msra.mxu1 %v3546_v4  ;;  %2357 = vmatprep.subr.bf16.mxu0 %v3551_v8 }
  0xcc   :  { %2398 = vmatprep.subr.bf16.mxu1 %v3554_v9 }
  0xce   :  { %2358 = vmatpush2.bf16.msra.mxu0 %v3549_v10 }
  0xcf   :  { %2399 = vmatpush2.bf16.msra.mxu1 %v3552_v11  ;;  %2409 = vmatprep.subr.bf16.mxu0 %v3557_v1 }
  0xd0   :  { %2450 = vmatprep.subr.bf16.mxu1 %v3560_v12  ;;  %v3555_v12 = vld [vmem:[#allocation8 + $0x4e0] ss:$16 sps:$4 sm:$0xff]  }
 0x121   :  { %v349_v13 = vpop.f32.mrf.mxu0 }
 0x122   :  { %v390_v14 = vpop.f32.mrf.mxu1 }
 0x123   :  { %v351_v15 = vpop.f32.mrf.mxu0 }
 0x124   :  { %v392_v16 = vpop.f32.mrf.mxu1 }
 0x125   :  { %v353_v17 = vpop.f32.mrf.mxu0 }
 0x126   :  { %v394_v18 = vpop.f32.mrf.mxu1  ;;  %v3563_v17 = vld [vmem:[#allocation8 + $0x4c4] ss:$16 sps:$4 sm:$0xff]  }
 0x127   :  { %v354_v19 = vpop.f32.mrf.mxu0 }
 0x128   :  { %v395_v20 = vpop.f32.mrf.mxu1 }
 0x129   :  { %v3566_v20 = vld [vmem:[#allocation8 + $0x6c4] ss:$16 sps:$4 sm:$0xff]  }
 0x131   :  { %v431_v21 = vpop.f32.mrf.mxu0 }
 0x132   :  { %v4141_v45 = vpop.f32.mrf.mxu1 }
 0x133   :  { %v433_v22 = vpop.f32.mrf.mxu0 }
 0x134   :  { %v474_v23 = vpop.f32.mrf.mxu1 }
 0x135   :  { %v435_v24 = vpop.f32.mrf.mxu0 }
 0x136   :  { %v476_v25 = vpop.f32.mrf.mxu1  ;;  %v3572_v24 = vld [vmem:[#allocation8 + $0x6a4] ss:$16 sps:$4 sm:$0xff]  }
 0x137   :  { %v436_v26 = vpop.f32.mrf.mxu0  ;;  %v3567_v25 = vld [vmem:[#allocation8 + $0x4a0] ss:$16 sps:$4 sm:$0xff]  }
 0x138   :  { %v477_v27 = vpop.f32.mrf.mxu1  ;;  %v3570_v26 = vld [vmem:[#allocation8 + $0x6a0] ss:$16 sps:$4 sm:$0xff]  }
 0x139   :  { %v3575_v27 = vld [vmem:[#allocation8 + $0x484] ss:$16 sps:$4 sm:$0xff]  }
 0x141   :  { %v705_v34 = vpop.f32.mrf.mxu0 }
 0x142   :  { %v746_v35 = vpop.f32.mrf.mxu1  ;;  %v835_v36 = vmax.f32 %v349_v13, %v705_v34  ;;  %v3576_v34 = vld [vmem:[#allocation8 + $0x680] ss:$16 sps:$4 sm:$0xff]  }
 0x143   :  { %v837_v37 = vmax.f32 %v390_v14, %v746_v35  ;;  %v707_v40 = vpop.f32.mrf.mxu0  ;;  %v3581_v35 = vld [vmem:[#allocation8 + $0x464] ss:$16 sps:$4 sm:$0xff]  }
 0x144   :  { %v748_v41 = vpop.f32.mrf.mxu1  ;;  %v885_v42 = vadd.f32 %v848_v32, %v835_v36  ;;  %v836_v44 = vmax.f32 %v351_v15, %v707_v40  ;;  %v3578_v32 = vld [vmem:[#allocation8 + $0x684] ss:$16 sps:$4 sm:$0xff]   ;;  %v871_v36 = vsub.s32 6, %v4130_v51  ;;  %v3579_v40 = vld [vmem:[#allocation8 + $0x460] ss:$16 sps:$4 sm:$0xff]  }
 0x145   :  { %v887_v43 = vadd.f32 %v856_v33, %v837_v37  ;;  %v838_v46 = vmax.f32 %v392_v16, %v748_v41  ;;  %v709_v47 = vpop.f32.mrf.mxu0  ;;  %v3558_v16 = vld [vmem:[#allocation8 + $0x6e0] ss:$16 sps:$4 sm:$0xff]   ;;  %v3584_v37 = vld [vmem:[#allocation8 + $0x664] ss:$16 sps:$4 sm:$0xff]  }
 0x146   :  { %v750_v48 = vpop.f32.mrf.mxu1  ;;  %3839 = vtanh.f32 %v885_v42  ;;  %v886_v49 = vadd.f32 %v852_v38, %v836_v44  ;;  %v3573_v33 = vld [vmem:[#allocation8 + $0x480] ss:$16 sps:$4 sm:$0xff]   ;;  %v3587_v44 = vld [vmem:[#allocation8 + $0x444] ss:$16 sps:$4 sm:$0xff]   ;;  %v872_v47 = vrot.slane %v4135_v5, %v871_v36  ;;  %v3648_v36 = vld [vmem:[#allocation8 + $0x48] ss:$16 sps:$4 sm:$0xff]  }
 0x147   :  { %v888_v50 = vadd.f32 %v860_v39, %v838_v46  ;;  %3841 = vtanh.f32 %v887_v43  ;;  %v710_v52 = vpop.f32.mrf.mxu0  ;;  %v3582_v43 = vld [vmem:[#allocation8 + $0x660] ss:$16 sps:$4 sm:$0xff]   ;;  %v3590_v48 = vld [vmem:[#allocation8 + $0x644] ss:$16 sps:$4 sm:$0xff]  }
 0x148   :  { %v751_v53 = vpop.f32.mrf.mxu1  ;;  %3843 = vtanh.f32 %v886_v49  ;;  %v3585_v49 = vld [vmem:[#allocation8 + $0x440] ss:$16 sps:$4 sm:$0xff]   ;;  %v3593_v52 = vld [vmem:[#allocation8 + $0x424] ss:$16 sps:$4 sm:$0xff]  }
 0x149   :  { %3845 = vtanh.f32 %v888_v50  ;;  %v3588_v50 = vld [vmem:[#allocation8 + $0x640] ss:$16 sps:$4 sm:$0xff]  }
 0x14a   :  { %v3594_v5 = vld [vmem:[#allocation8 + $0x620] ss:$16 sps:$4 sm:$0xff]  }
 0x151   :  { %v787_v56 = vpop.f32.mrf.mxu0 }
 0x152   :  { %v4161_v57 = vpop.f32.mrf.mxu1  ;;  %v839_v58 = vmax.f32 %v431_v21, %v787_v56  ;;  %v3561_v21 = vld [vmem:[#allocation8 + $0x4c0] ss:$16 sps:$4 sm:$0xff]   ;;  %v3602_v56 = vld [vmem:[#allocation8 + $0x604] ss:$16 sps:$4 sm:$0xff]  }
 0x153   :  { %v3840_v60 = vpop.eup %3839  ;;  %v789_v61 = vpop.f32.mrf.mxu0  ;;  %v841_v46 = vmax.f32 %v4141_v45, %v4161_v57  ;;  %v3591_v45 = vld [vmem:[#allocation8 + $0x420] ss:$16 sps:$4 sm:$0xff]  }
 0x154   :  { %v830_v62 = vpop.f32.mrf.mxu1  ;;  %v3842_v0 = vpop.eup %3841  ;;  %v4166_v2 = vadd.f32 %v4139_v7, %v839_v58  ;;  %v840_v3 = vmax.f32 %v433_v22, %v789_v61  ;;  %v4170_v13 = vpack.c.bf16 %v3840_v60, %v3840_v60  ;;  %v3564_v22 = vld [vmem:[#allocation8 + $0x6c0] ss:$16 sps:$4 sm:$0xff]   ;;  %v3608_v60 = vld [vmem:[#allocation8 + $0x724] ss:$16 sps:$4 sm:$0xff]  }
 0x155   :  { %v3844_v4 = vpop.eup %3843  ;;  %v842_v6 = vmax.f32 %v474_v23, %v830_v62  ;;  %v791_v9 = vpop.f32.mrf.mxu0  ;;  %v4174_v19 = vpack.c.bf16 %v3842_v0, %v3842_v0  ;;  %v3569_v23 = vld [vmem:[#allocation8 + $0x4a4] ss:$16 sps:$4 sm:$0xff]   ;;  %v891_v53 = vadd.f32 %v872_v47, %v841_v46  ;;  %v3597_v57 = vld [vmem:[#allocation8 + $0x400] ss:$16 sps:$4 sm:$0xff]   ;;  %v3662_v46 = vld [vmem:[#allocation8 + $0x2cc] ss:$16 sps:$4 sm:$0xff]  }
 0x156   :  { %v832_v8 = vpop.f32.mrf.mxu1  ;;  %v3846_v10 = vpop.eup %3845  ;;  %v890_v11 = vadd.f32 %v868_v59, %v840_v3  ;;  %v4168_v1 = vpack.c.bf16 %v3844_v4, %v3844_v4  ;;  %v3600_v58 = vld [vmem:[#allocation8 + $0x600] ss:$16 sps:$4 sm:$0xff]   ;;  %v3605_v59 = vld [vmem:[#allocation8 + $0x5e4] ss:$16 sps:$4 sm:$0xff]   ;;  %v3659_v47 = vld [vmem:[#allocation8 + $0xc] ss:$16 sps:$4 sm:$0xff]  }
 0x157   :  { %v892_v14 = vadd.f32 %v876_v63, %v842_v6  ;;  %v4172_v15 = vpack.c.bf16 %v3846_v10, %v3846_v10  ;;  %v792_v7 = vpop.f32.mrf.mxu0  ;;  %v3603_v61 = vld [vmem:[#allocation8 + $0x5e0] ss:$16 sps:$4 sm:$0xff]   ;;  %v3611_v63 = vld [vmem:[#allocation8 + $0x5c4] ss:$16 sps:$4 sm:$0xff]   ;;  %v3620_v8 = vld [vmem:[#allocation8 + $0xec] ss:$16 sps:$4 sm:$0xff]  }
 0x158   :  { %v833_v18 = vpop.f32.mrf.mxu1  ;;  %3847 = vtanh.f32 %v890_v11  ;;  %2359 = vmatprep.mubr.bf16.mxu0 %v4168_v1  ;;  %v3606_v62 = vld [vmem:[#allocation8 + $0x720] ss:$16 sps:$4 sm:$0xff]   ;;  %v3614_v0 = vld [vmem:[#allocation8 + $0x704] ss:$16 sps:$4 sm:$0xff]   ;;  %v3618_v11 = vld [vmem:[#allocation8 + $0xe8] ss:$16 sps:$4 sm:$0xff]  }
 0x159   :  { %3849 = vtanh.f32 %v892_v14  ;;  %2400 = vmatprep.mubr.bf16.mxu1 %v4172_v15  ;;  %2360 = vmatmul.mubr.bf16.vlgmr.msra.gmra.mxu0 %v4170_v13  ;;  %v3609_v3 = vld [vmem:[#allocation8 + $0x5c0] ss:$16 sps:$4 sm:$0xff]   ;;  %v3617_v6 = vld [vmem:[#allocation8 + $0x5a4] ss:$16 sps:$4 sm:$0xff]   ;;  %v3624_v18 = vld [vmem:[#allocation8 + $0xc8] ss:$16 sps:$4 sm:$0xff]  }
 0x15a   :  { %2401 = vmatmul.mubr.bf16.vlgmr.msra.gmra.mxu1 %v4174_v19  ;;  %2410 = vmatpush1.bf16.msra.mxu0 %v3555_v12  ;;  %3851 = vtanh.f32 %v891_v53  ;;  %v3612_v4 = vld [vmem:[#allocation8 + $0x700] ss:$16 sps:$4 sm:$0xff]   ;;  %v3623_v14 = vld [vmem:[#allocation8 + $0x584] ss:$16 sps:$4 sm:$0xff]   ;;  %v3666_v53 = vld [vmem:[#allocation8 + $0x2a8] ss:$16 sps:$4 sm:$0xff]  }
 0x15b   :  { %2451 = vmatpush1.bf16.msra.mxu1 %v3558_v16  ;;  %2411 = vmatprep.subr.bf16.mxu0 %v3563_v17  ;;  %v3615_v10 = vld [vmem:[#allocation8 + $0x5a0] ss:$16 sps:$4 sm:$0xff]   ;;  %v3626_v16 = vld [vmem:[#allocation8 + $0xcc] ss:$16 sps:$4 sm:$0xff]   ;;  %v3629_v7 = vld [vmem:[#allocation8 + $0x564] ss:$16 sps:$4 sm:$0xff]   ;;  %3853 = vtanh.f32 %v4166_v2 }
 0x15c   :  { %2452 = vmatprep.subr.bf16.mxu1 %v3566_v20  ;;  %v3621_v17 = vld [vmem:[#allocation8 + $0x580] ss:$16 sps:$4 sm:$0xff]   ;;  %v3632_v20 = vld [vmem:[#allocation8 + $0xac] ss:$16 sps:$4 sm:$0xff]   ;;  %v3647_v2 = vld [vmem:[#allocation8 + $0x504] ss:$16 sps:$4 sm:$0xff]  }
 0x15e   :  { %2412 = vmatpush1.bf16.msra.mxu0 %v3561_v21  ;;  %v3627_v21 = vld [vmem:[#allocation8 + $0x560] ss:$16 sps:$4 sm:$0xff]  }
 0x15f   :  { %2453 = vmatpush1.bf16.msra.mxu1 %v3564_v22  ;;  %2413 = vmatprep.subr.bf16.mxu0 %v3569_v23  ;;  %v3630_v22 = vld [vmem:[#allocation8 + $0xa8] ss:$16 sps:$4 sm:$0xff]   ;;  %v3635_v23 = vld [vmem:[#allocation8 + $0x544] ss:$16 sps:$4 sm:$0xff]  }
 0x160   :  { %2454 = vmatprep.subr.bf16.mxu1 %v3572_v24  ;;  %v3638_v24 = vld [vmem:[#allocation8 + $0x8c] ss:$16 sps:$4 sm:$0xff]  }
 0x162   :  { %2414 = vmatpush1.bf16.msra.mxu0 %v3567_v25  ;;  %v3633_v25 = vld [vmem:[#allocation8 + $0x540] ss:$16 sps:$4 sm:$0xff]  }
 0x163   :  { %2455 = vmatpush1.bf16.msra.mxu1 %v3570_v26  ;;  %2415 = vmatprep.subr.bf16.mxu0 %v3575_v27  ;;  %v3641_v26 = vld [vmem:[#allocation8 + $0x524] ss:$16 sps:$4 sm:$0xff]   ;;  %v3644_v27 = vld [vmem:[#allocation8 + $0x6c] ss:$16 sps:$4 sm:$0xff]  }
 0x164   :  { %2456 = vmatprep.subr.bf16.mxu1 %v3578_v32  ;;  %v3639_v32 = vld [vmem:[#allocation8 + $0x520] ss:$16 sps:$4 sm:$0xff]  }
 0x165   :  { %v3848_v38 = vpop.eup %3847 }
 0x166   :  { %v3850_v39 = vpop.eup %3849  ;;  %2416 = vmatpush1.bf16.msra.mxu0 %v3573_v33  ;;  %v4181_v41 = vpack.c.bf16 %v3848_v38, %v3848_v38  ;;  %v3642_v33 = vld [vmem:[#allocation8 + $0x68] ss:$16 sps:$4 sm:$0xff]  }
 0x167   :  { %v4183_v42 = vpack.c.bf16 %v3850_v39, %v3850_v39  ;;  %2457 = vmatpush1.bf16.msra.mxu1 %v3576_v34  ;;  %2417 = vmatprep.subr.bf16.mxu0 %v3581_v35  ;;  %v3852_v9 = vpop.eup %3851  ;;  %v3650_v34 = vld [vmem:[#allocation8 + $0x4c] ss:$16 sps:$4 sm:$0xff]   ;;  %v3645_v35 = vld [vmem:[#allocation8 + $0x500] ss:$16 sps:$4 sm:$0xff]  }
 0x168   :  { %2441 = vmatprep.mubr.bf16.mxu0 %v4181_v41  ;;  %2458 = vmatprep.subr.bf16.mxu1 %v3584_v37  ;;  %v4191_v12 = vpack.c.bf16 %v3852_v9, %v3852_v9  ;;  %v3656_v37 = vld [vmem:[#allocation8 + $0x2ec] ss:$16 sps:$4 sm:$0xff]   ;;  %v3854_v38 = vpop.eup %3853 }
 0x169   :  { %3349 = vmatprep.mubr.msk.bf16.mxu1 %vm2323_vm2, %v4183_v42  ;;  %v3653_v39 = vld [vmem:[#allocation8 + $0x2c] ss:$16 sps:$4 sm:$0xff]  }
 0x16a   :  { %2418 = vmatpush1.bf16.msra.mxu0 %v3579_v40  ;;  %v3654_v40 = vld [vmem:[#allocation8 + $0x2e8] ss:$16 sps:$4 sm:$0xff]   ;;  %v3695_v9 = vld [vmem:[#allocation8 + $0x14c] ss:$16 sps:$4 sm:$0xff]  }
 0x16b   :  { %2459 = vmatpush1.bf16.msra.mxu1 %v3582_v43  ;;  %2419 = vmatprep.subr.bf16.mxu0 %v3587_v44  ;;  %v4196_v43 = vpack.c.bf16 %v3854_v38, %v3854_v38  ;;  %v3651_v44 = vld [vmem:[#allocation8 + $0x28] ss:$16 sps:$4 sm:$0xff]   ;;  %v3734_v38 = vld [vmem:[#allocation8 + $0x48c] ss:$16 sps:$4 sm:$0xff]  }
 0x16c   :  { %2460 = vmatprep.subr.bf16.mxu1 %v3590_v48  ;;  %v3660_v48 = vld [vmem:[#allocation8 + $0x2c8] ss:$16 sps:$4 sm:$0xff]  }
 0x16e   :  { %2420 = vmatpush1.bf16.msra.mxu0 %v3585_v49  ;;  %v3657_v49 = vld [vmem:[#allocation8 + $0x8] ss:$16 sps:$4 sm:$0xff]  }
 0x16f   :  { %2461 = vmatpush1.bf16.msra.mxu1 %v3588_v50  ;;  %2421 = vmatprep.subr.bf16.mxu0 %v3593_v52  ;;  %v3668_v50 = vld [vmem:[#allocation8 + $0x2ac] ss:$16 sps:$4 sm:$0xff]  }
 0x170   :  { %2462 = vmatprep.subr.bf16.mxu1 %v3596_v54  ;;  %v3665_v52 = vld [vmem:[#allocation8 + $0x1ec] ss:$16 sps:$4 sm:$0xff]   ;;  %v3663_v54 = vld [vmem:[#allocation8 + $0x1e8] ss:$16 sps:$4 sm:$0xff]  }
 0x172   :  { %2422 = vmatpush1.bf16.msra.mxu0 %v3591_v45  ;;  %v3674_v45 = vld [vmem:[#allocation8 + $0x28c] ss:$16 sps:$4 sm:$0xff]  }
 0x173   :  { %2463 = vmatpush1.bf16.msra.mxu1 %v3594_v5  ;;  %2423 = vmatprep.subr.bf16.mxu0 %v3599_v55  ;;  %v3671_v5 = vld [vmem:[#allocation8 + $0x1cc] ss:$16 sps:$4 sm:$0xff]   ;;  %v3672_v55 = vld [vmem:[#allocation8 + $0x288] ss:$16 sps:$4 sm:$0xff]  }
 0x174   :  { %2464 = vmatprep.subr.bf16.mxu1 %v3602_v56  ;;  %v3669_v56 = vld [vmem:[#allocation8 + $0x1c8] ss:$16 sps:$4 sm:$0xff]  }
 0x176   :  { %2424 = vmatpush1.bf16.msra.mxu0 %v3597_v57  ;;  %v3677_v57 = vld [vmem:[#allocation8 + $0x1ac] ss:$16 sps:$4 sm:$0xff]  }
 0x177   :  { %2465 = vmatpush1.bf16.msra.mxu1 %v3600_v58  ;;  %2425 = vmatprep.subr.bf16.mxu0 %v3605_v59  ;;  %v3678_v58 = vld [vmem:[#allocation8 + $0x268] ss:$16 sps:$4 sm:$0xff]  }
 0x178   :  { %2478 = vmatprep.subr.bf16.mxu1 %v3608_v60  ;;  %v3675_v59 = vld [vmem:[#allocation8 + $0x1a8] ss:$16 sps:$4 sm:$0xff]   ;;  %v3686_v60 = vld [vmem:[#allocation8 + $0x24c] ss:$16 sps:$4 sm:$0xff]  }
 0x17a   :  { %2426 = vmatpush2.bf16.msra.mxu0 %v3603_v61  ;;  %v3683_v61 = vld [vmem:[#allocation8 + $0x18c] ss:$16 sps:$4 sm:$0xff]  }
 0x17b   :  { %2479 = vmatpush2.bf16.msra.mxu1 %v3606_v62  ;;  %2427 = vmatprep.subr.bf16.mxu0 %v3611_v63  ;;  %v3684_v62 = vld [vmem:[#allocation8 + $0x248] ss:$16 sps:$4 sm:$0xff]  }
 0x17c   :  { %2480 = vmatprep.subr.bf16.mxu1 %v3614_v0  ;;  %v3681_v63 = vld [vmem:[#allocation8 + $0x188] ss:$16 sps:$4 sm:$0xff]   ;;  %v3692_v0 = vld [vmem:[#allocation8 + $0x22c] ss:$16 sps:$4 sm:$0xff]  }
 0x17e   :  { %2428 = vmatpush2.bf16.msra.mxu0 %v3609_v3  ;;  %v3689_v3 = vld [vmem:[#allocation8 + $0x16c] ss:$16 sps:$4 sm:$0xff]  }
 0x17f   :  { %2481 = vmatpush2.bf16.msra.mxu1 %v3612_v4  ;;  %2429 = vmatprep.subr.bf16.mxu0 %v3617_v6  ;;  %v3690_v4 = vld [vmem:[#allocation8 + $0x228] ss:$16 sps:$4 sm:$0xff]  }
 0x180   :  { %2491 = vmatprep.subr.bf16.mxu1 %v3620_v8  ;;  %v3687_v6 = vld [vmem:[#allocation8 + $0x168] ss:$16 sps:$4 sm:$0xff]   ;;  %v3698_v8 = vld [vmem:[#allocation8 + $0x20c] ss:$16 sps:$4 sm:$0xff]  }
 0x182   :  { %2483 = vmatmul.mubr.bf16.vlgmr.msra.gmra.mxu1 %v4191_v12  ;;  %2430 = vmatpush2.bf16.msra.mxu0 %v3615_v10  ;;  %v3696_v10 = vld [vmem:[#allocation8 + $0x208] ss:$16 sps:$4 sm:$0xff]  }
 0x183   :  { %2492 = vmatpush1.bf16.msra.mxu1 %v3618_v11  ;;  %2523 = vmatprep.mubr.bf16.mxu1 %v4168_v1  ;;  %v3636_v1 = vld [vmem:[#allocation8 + $0x88] ss:$16 sps:$4 sm:$0xff]  }
 0x184   :  { %2431 = vmatprep.subr.bf16.mxu0 %v3623_v14  ;;  %2493 = vmatprep.subr.bf16.mxu1 %v3626_v16  ;;  %v3693_v11 = vld [vmem:[#allocation8 + $0x148] ss:$16 sps:$4 sm:$0xff]   ;;  %v3704_v14 = vld [vmem:[#allocation8 + $0x3ec] ss:$16 sps:$4 sm:$0xff]  }
 0x185   :  { %v3701_v16 = vld [vmem:[#allocation8 + $0x12c] ss:$16 sps:$4 sm:$0xff]  }
 0x186   :  { %2432 = vmatpush2.bf16.msra.mxu0 %v3621_v17  ;;  %v3702_v17 = vld [vmem:[#allocation8 + $0x3e8] ss:$16 sps:$4 sm:$0xff]  }
 0x187   :  { %2494 = vmatpush1.bf16.msra.mxu1 %v3624_v18  ;;  %2433 = vmatprep.subr.bf16.mxu0 %v3629_v7  ;;  %v3699_v18 = vld [vmem:[#allocation8 + $0x128] ss:$16 sps:$4 sm:$0xff]   ;;  %v3710_v7 = vld [vmem:[#allocation8 + $0x3cc] ss:$16 sps:$4 sm:$0xff]  }
 0x188   :  { %2495 = vmatprep.subr.bf16.mxu1 %v3632_v20  ;;  %v3707_v20 = vld [vmem:[#allocation8 + $0x10c] ss:$16 sps:$4 sm:$0xff]  }
 0x18a   :  { %2434 = vmatpush2.bf16.msra.mxu0 %v3627_v21  ;;  %v3708_v21 = vld [vmem:[#allocation8 + $0x3c8] ss:$16 sps:$4 sm:$0xff]  }
 0x18b   :  { %2496 = vmatpush1.bf16.msra.mxu1 %v3630_v22  ;;  %2435 = vmatprep.subr.bf16.mxu0 %v3635_v23  ;;  %v3705_v22 = vld [vmem:[#allocation8 + $0x108] ss:$16 sps:$4 sm:$0xff]   ;;  %v3713_v23 = vld [vmem:[#allocation8 + $0x3ac] ss:$16 sps:$4 sm:$0xff]  }
 0x18c   :  { %2497 = vmatprep.subr.bf16.mxu1 %v3638_v24  ;;  %v3716_v24 = vld [vmem:[#allocation8 + $0x4ec] ss:$16 sps:$4 sm:$0xff]  }
 0x18e   :  { %2436 = vmatpush2.bf16.msra.mxu0 %v3633_v25  ;;  %v3711_v25 = vld [vmem:[#allocation8 + $0x3a8] ss:$16 sps:$4 sm:$0xff]  }
 0x18f   :  { %2498 = vmatpush1.bf16.msra.mxu1 %v3636_v1  ;;  %2437 = vmatprep.subr.bf16.mxu0 %v3641_v26  ;;  %v3714_v1 = vld [vmem:[#allocation8 + $0x4e8] ss:$16 sps:$4 sm:$0xff]   ;;  %v3719_v26 = vld [vmem:[#allocation8 + $0x38c] ss:$16 sps:$4 sm:$0xff]  }
 0x190   :  { %2499 = vmatprep.subr.bf16.mxu1 %v3644_v27  ;;  %v3722_v27 = vld [vmem:[#allocation8 + $0x4cc] ss:$16 sps:$4 sm:$0xff]  }
 0x192   :  { %2438 = vmatpush2.bf16.msra.mxu0 %v3639_v32  ;;  %v3717_v32 = vld [vmem:[#allocation8 + $0x388] ss:$16 sps:$4 sm:$0xff]  }
 0x193   :  { %2500 = vmatpush1.bf16.msra.mxu1 %v3642_v33  ;;  %2439 = vmatprep.subr.bf16.mxu0 %v3647_v2  ;;  %v3720_v33 = vld [vmem:[#allocation8 + $0x4c8] ss:$16 sps:$4 sm:$0xff]   ;;  %v3725_v2 = vld [vmem:[#allocation8 + $0x36c] ss:$16 sps:$4 sm:$0xff]  }
 0x194   :  { %2501 = vmatprep.subr.bf16.mxu1 %v3650_v34  ;;  %v3728_v34 = vld [vmem:[#allocation8 + $0x4ac] ss:$16 sps:$4 sm:$0xff]  }
 0x196   :  { %2440 = vmatpush2.bf16.msra.mxu0 %v3645_v35  ;;  %v3723_v35 = vld [vmem:[#allocation8 + $0x368] ss:$16 sps:$4 sm:$0xff]  }
 0x197   :  { %2502 = vmatpush1.bf16.msra.mxu1 %v3648_v36  ;;  %2532 = vmatprep.subr.bf16.mxu0 %v3656_v37  ;;  %v3726_v36 = vld [vmem:[#allocation8 + $0x4a8] ss:$16 sps:$4 sm:$0xff]   ;;  %v3731_v37 = vld [vmem:[#allocation8 + $0x34c] ss:$16 sps:$4 sm:$0xff]  }
 0x198   :  { %2503 = vmatprep.subr.bf16.mxu1 %v3653_v39  ;;  %v3732_v39 = vld [vmem:[#allocation8 + $0x488] ss:$16 sps:$4 sm:$0xff]  }
 0x199   :  { %2442 = vmatmul.mubr.bf16.vlgmr.msra.gmra.mxu0 %v4196_v43 }
 0x19a   :  { %2533 = vmatpush1.bf16.msra.mxu0 %v3654_v40  ;;  %2564 = vmatprep.mubr.bf16.mxu0 %v4172_v15  ;;  %v3680_v15 = vld [vmem:[#allocation8 + $0x26c] ss:$16 sps:$4 sm:$0xff]  }
 0x19b   :  { %2504 = vmatpush1.bf16.msra.mxu1 %v3651_v44  ;;  %2534 = vmatprep.subr.bf16.mxu0 %v3662_v46  ;;  %v3737_v40 = vld [vmem:[#allocation8 + $0x32c] ss:$16 sps:$4 sm:$0xff]   ;;  %v3735_v44 = vld [vmem:[#allocation8 + $0x328] ss:$16 sps:$4 sm:$0xff]  }
 0x19c   :  { %2505 = vmatprep.subr.bf16.mxu1 %v3659_v47  ;;  %v3738_v46 = vld [vmem:[#allocation8 + $0x468] ss:$16 sps:$4 sm:$0xff]   ;;  %v3743_v47 = vld [vmem:[#allocation8 + $0x30c] ss:$16 sps:$4 sm:$0xff]  }
 0x19e   :  { %2535 = vmatpush1.bf16.msra.mxu0 %v3660_v48  ;;  %v3746_v48 = vld [vmem:[#allocation8 + $0x44c] ss:$16 sps:$4 sm:$0xff]  }
 0x19f   :  { %2506 = vmatpush1.bf16.msra.mxu1 %v3657_v49  ;;  %2536 = vmatprep.subr.bf16.mxu0 %v3668_v50  ;;  %v3741_v49 = vld [vmem:[#allocation8 + $0x308] ss:$16 sps:$4 sm:$0xff]  }
 0x1a0   :  { %2507 = vmatprep.subr.bf16.mxu1 %v3665_v52  ;;  %v3744_v50 = vld [vmem:[#allocation8 + $0x448] ss:$16 sps:$4 sm:$0xff]   ;;  %v3752_v52 = vld [vmem:[#allocation8 + $0x6ec] ss:$16 sps:$4 sm:$0xff]  }
 0x1a2   :  { %2537 = vmatpush1.bf16.msra.mxu0 %v3666_v53  ;;  %v3749_v53 = vld [vmem:[#allocation8 + $0x42c] ss:$16 sps:$4 sm:$0xff]  }
 0x1a3   :  { %2508 = vmatpush2.bf16.msra.mxu1 %v3663_v54  ;;  %2538 = vmatprep.subr.bf16.mxu0 %v3674_v45  ;;  %v3750_v54 = vld [vmem:[#allocation8 + $0x6e8] ss:$16 sps:$4 sm:$0xff]  }
 0x1a4   :  { %2509 = vmatprep.subr.bf16.mxu1 %v3671_v5  ;;  %v3747_v45 = vld [vmem:[#allocation8 + $0x428] ss:$16 sps:$4 sm:$0xff]   ;;  %v3758_v5 = vld [vmem:[#allocation8 + $0x6cc] ss:$16 sps:$4 sm:$0xff]  }
 0x1a6   :  { %2539 = vmatpush1.bf16.msra.mxu0 %v3672_v55  ;;  %v3755_v55 = vld [vmem:[#allocation8 + $0x40c] ss:$16 sps:$4 sm:$0xff]  }
 0x1a7   :  { %2510 = vmatpush2.bf16.msra.mxu1 %v3669_v56  ;;  %2540 = vmatprep.subr.bf16.mxu0 %v3680_v15  ;;  %v3756_v56 = vld [vmem:[#allocation8 + $0x6c8] ss:$16 sps:$4 sm:$0xff]  }
 0x1a8   :  { %2511 = vmatprep.subr.bf16.mxu1 %v3677_v57  ;;  %v3753_v15 = vld [vmem:[#allocation8 + $0x408] ss:$16 sps:$4 sm:$0xff]   ;;  %v3764_v57 = vld [vmem:[#allocation8 + $0x6ac] ss:$16 sps:$4 sm:$0xff]  }
 0x1aa   :  { %2541 = vmatpush1.bf16.msra.mxu0 %v3678_v58  ;;  %v3761_v58 = vld [vmem:[#allocation8 + $0x5ec] ss:$16 sps:$4 sm:$0xff]  }
 0x1ab   :  { %2512 = vmatpush2.bf16.msra.mxu1 %v3675_v59  ;;  %2542 = vmatprep.subr.bf16.mxu0 %v3686_v60  ;;  %v3762_v59 = vld [vmem:[#allocation8 + $0x6a8] ss:$16 sps:$4 sm:$0xff]  }
 0x1ac   :  { %2513 = vmatprep.subr.bf16.mxu1 %v3683_v61  ;;  %v3759_v60 = vld [vmem:[#allocation8 + $0x5e8] ss:$16 sps:$4 sm:$0xff]   ;;  %v3770_v61 = vld [vmem:[#allocation8 + $0x68c] ss:$16 sps:$4 sm:$0xff]  }
 0x1ae   :  { %2543 = vmatpush1.bf16.msra.mxu0 %v3684_v62  ;;  %v3767_v62 = vld [vmem:[#allocation8 + $0x5cc] ss:$16 sps:$4 sm:$0xff]  }
 0x1af   :  { %2514 = vmatpush2.bf16.msra.mxu1 %v3681_v63  ;;  %2544 = vmatprep.subr.bf16.mxu0 %v3692_v0  ;;  %v3765_v63 = vld [vmem:[#allocation8 + $0x5c8] ss:$16 sps:$4 sm:$0xff]   ;;  %v3773_v0 = vld [vmem:[#allocation8 + $0x5ac] ss:$16 sps:$4 sm:$0xff]  }
 0x1b0   :  { %2515 = vmatprep.subr.bf16.mxu1 %v3689_v3  ;;  %v3774_v3 = vld [vmem:[#allocation8 + $0x668] ss:$16 sps:$4 sm:$0xff]  }
 0x1b2   :  { %2545 = vmatpush1.bf16.msra.mxu0 %v3690_v4  ;;  %v3771_v4 = vld [vmem:[#allocation8 + $0x5a8] ss:$16 sps:$4 sm:$0xff]  }
 0x1b3   :  { %2516 = vmatpush2.bf16.msra.mxu1 %v3687_v6  ;;  %2546 = vmatprep.subr.bf16.mxu0 %v3698_v8  ;;  %v3782_v6 = vld [vmem:[#allocation8 + $0x64c] ss:$16 sps:$4 sm:$0xff]  }
 0x1b4   :  { %2517 = vmatprep.subr.bf16.mxu1 %v3695_v9  ;;  %v3779_v8 = vld [vmem:[#allocation8 + $0x58c] ss:$16 sps:$4 sm:$0xff]   ;;  %v3780_v9 = vld [vmem:[#allocation8 + $0x648] ss:$16 sps:$4 sm:$0xff]  }
 0x1b6   :  { %2547 = vmatpush1.bf16.msra.mxu0 %v3696_v10  ;;  %v3777_v10 = vld [vmem:[#allocation8 + $0x588] ss:$16 sps:$4 sm:$0xff]  }
 0x1b7   :  { %2518 = vmatpush2.bf16.msra.mxu1 %v3693_v11  ;;  %2548 = vmatprep.subr.bf16.mxu0 %v3704_v14  ;;  %v3788_v11 = vld [vmem:[#allocation8 + $0x62c] ss:$16 sps:$4 sm:$0xff]  }
 0x1b8   :  { %2519 = vmatprep.subr.bf16.mxu1 %v3701_v16  ;;  %v3785_v14 = vld [vmem:[#allocation8 + $0x56c] ss:$16 sps:$4 sm:$0xff]   ;;  %v3786_v16 = vld [vmem:[#allocation8 + $0x628] ss:$16 sps:$4 sm:$0xff]  }
 0x1ba   :  { %2549 = vmatpush2.bf16.msra.mxu0 %v3702_v17  ;;  %v3783_v17 = vld [vmem:[#allocation8 + $0x568] ss:$16 sps:$4 sm:$0xff]  }
 0x1bb   :  { %2520 = vmatpush2.bf16.msra.mxu1 %v3699_v18  ;;  %2550 = vmatprep.subr.bf16.mxu0 %v3710_v7  ;;  %v3794_v18 = vld [vmem:[#allocation8 + $0x60c] ss:$16 sps:$4 sm:$0xff]  }
 0x1bc   :  { %2521 = vmatprep.subr.bf16.mxu1 %v3707_v20  ;;  %v3791_v7 = vld [vmem:[#allocation8 + $0x54c] ss:$16 sps:$4 sm:$0xff]   ;;  %v3792_v20 = vld [vmem:[#allocation8 + $0x608] ss:$16 sps:$4 sm:$0xff]  }
 0x1be   :  { %2551 = vmatpush2.bf16.msra.mxu0 %v3708_v21  ;;  %v3789_v21 = vld [vmem:[#allocation8 + $0x548] ss:$16 sps:$4 sm:$0xff]  }
 0x1bf   :  { %2522 = vmatpush2.bf16.msra.mxu1 %v3705_v22  ;;  %2552 = vmatprep.subr.bf16.mxu0 %v3713_v23  ;;  %v3800_v22 = vld [vmem:[#allocation8 + $0x72c] ss:$16 sps:$4 sm:$0xff]  }
 0x1c0   :  { %2573 = vmatprep.subr.bf16.mxu1 %v3716_v24  ;;  %v3797_v23 = vld [vmem:[#allocation8 + $0x52c] ss:$16 sps:$4 sm:$0xff]   ;;  %v3798_v24 = vld [vmem:[#allocation8 + $0x728] ss:$16 sps:$4 sm:$0xff]  }
 0x1c2   :  { %2524 = vmatmul.mubr.bf16.vlgmr.msra.gmra.mxu1 %v4170_v13  ;;  %2553 = vmatpush2.bf16.msra.mxu0 %v3711_v25  ;;  %v3729_v13 = vld [vmem:[#allocation8 + $0x348] ss:$16 sps:$4 sm:$0xff]  }
 0x1c3   :  { %2574 = vmatpush1.bf16.msra.mxu1 %v3714_v1  ;;  %2605 = vmatprep.mubr.bf16.mxu1 %v4181_v41  ;;  %v3740_v41 = vld [vmem:[#allocation8 + $0x46c] ss:$16 sps:$4 sm:$0xff]   ;;  %v3795_v25 = vld [vmem:[#allocation8 + $0x528] ss:$16 sps:$4 sm:$0xff]  }
 0x1c4   :  { %2554 = vmatprep.subr.bf16.mxu0 %v3719_v26  ;;  %2575 = vmatprep.subr.bf16.mxu1 %v3722_v27  ;;  %v3806_v1 = vld [vmem:[#allocation8 + $0x70c] ss:$16 sps:$4 sm:$0xff]   ;;  %v3804_v27 = vld [vmem:[#allocation8 + $0x708] ss:$16 sps:$4 sm:$0xff]  }
 0x1c5   :  { %v3803_v26 = vld [vmem:[#allocation8 + $0x50c] ss:$16 sps:$4 sm:$0xff]  }
 0x1c6   :  { %2555 = vmatpush2.bf16.msra.mxu0 %v3717_v32  ;;  %v3801_v32 = vld [vmem:[#allocation8 + $0x508] ss:$16 sps:$4 sm:$0xff]  }
 0x1c7   :  { %2576 = vmatpush1.bf16.msra.mxu1 %v3720_v33  ;;  %2556 = vmatprep.subr.bf16.mxu0 %v3725_v2  ;;  %v3807_v33 = vld [vmem:[#allocation11 + $0x78] sm:$0xff]  }
 0x1c8   :  { %2577 = vmatprep.subr.bf16.mxu1 %v3728_v34  ;;  %v3808_v2 = vld [vmem:[#allocation11 + $0x38] sm:$0xff]   ;;  %v3809_v34 = vld [vmem:[#allocation11 + $0x70] sm:$0xff]  }
 0x1ca   :  { %2557 = vmatpush2.bf16.msra.mxu0 %v3723_v35  ;;  %v3810_v35 = vld [vmem:[#allocation11 + $0x30] sm:$0xff]  }
 0x1cb   :  { %2578 = vmatpush1.bf16.msra.mxu1 %v3726_v36  ;;  %2558 = vmatprep.subr.bf16.mxu0 %v3731_v37  ;;  %v3811_v36 = vld [vmem:[#allocation11 + $0x68] sm:$0xff]  }
 0x1cc   :  { %2579 = vmatprep.subr.bf16.mxu1 %v3734_v38  ;;  %v3812_v37 = vld [vmem:[#allocation11 + $0x28] sm:$0xff]   ;;  %v3813_v38 = vld [vmem:[#allocation11 + $0x60] sm:$0xff]  }
 0x1ce   :  { %2559 = vmatpush2.bf16.msra.mxu0 %v3729_v13  ;;  %v3814_v13 = vld [vmem:[#allocation11 + $0x20] sm:$0xff]  }
 0x1cf   :  { %2580 = vmatpush1.bf16.msra.mxu1 %v3732_v39  ;;  %2560 = vmatprep.subr.bf16.mxu0 %v3737_v40  ;;  %v3815_v39 = vld [vmem:[#allocation11 + $0x58] sm:$0xff]  }
 0x1d0   :  { %2581 = vmatprep.subr.bf16.mxu1 %v3740_v41  ;;  %v3816_v40 = vld [vmem:[#allocation11 + $0x18] sm:$0xff]   ;;  %v3817_v41 = vld [vmem:[#allocation11 + $0x50] sm:$0xff]  }
 0x1d2   :  { %2561 = vmatpush2.bf16.msra.mxu0 %v3735_v44  ;;  %v3820_v44 = vld [vmem:[#allocation11 + $0x8] sm:$0xff]  }
 0x1d3   :  { %2582 = vmatpush1.bf16.msra.mxu1 %v3738_v46  ;;  %2562 = vmatprep.subr.bf16.mxu0 %v3743_v47  ;;  %v3821_v46 = vld [vmem:[#allocation11 + $0x40] sm:$0xff]  }
 0x1d4   :  { %2583 = vmatprep.subr.bf16.mxu1 %v3746_v48 }
 0x1d6   :  { %2563 = vmatpush2.bf16.msra.mxu0 %v3741_v49  ;;  %v3822_v49 = vld [vmem:[#allocation11] sm:$0xff]  }
 0x1d7   :  { %2584 = vmatpush1.bf16.msra.mxu1 %v3744_v50  ;;  %2614 = vmatprep.subr.bf16.mxu0 %v3752_v52 }
 0x1d8   :  { %2585 = vmatprep.subr.bf16.mxu1 %v3749_v53 }
 0x1d9   :  { %2565 = vmatmul.mubr.bf16.vlgmr.msra.gmra.mxu0 %v4174_v19  ;;  %v3768_v19 = vld [vmem:[#allocation8 + $0x688] ss:$16 sps:$4 sm:$0xff]  }
 0x1da   :  { %2615 = vmatpush1.bf16.msra.mxu0 %v3750_v54  ;;  %3350 = vmatprep.mubr.msk.bf16.mxu0 %vm2323_vm2, %v4183_v42  ;;  %v3776_v42 = vld [vmem:[#allocation8 + $0x66c] ss:$16 sps:$4 sm:$0xff]  }
 0x1db   :  { %2586 = vmatpush1.bf16.msra.mxu1 %v3747_v45  ;;  %2616 = vmatprep.subr.bf16.mxu0 %v3758_v5  ;;  %v3823_v5 = vld [vmem:[#allocation11 + $0xf8] sm:$0xff]  }
 0x1dc   :  { %2587 = vmatprep.subr.bf16.mxu1 %v3755_v55  ;;  %v3824_v55 = vld [vmem:[#allocation11 + $0xb8] sm:$0xff]  }
 0x1de   :  { %2617 = vmatpush1.bf16.msra.mxu0 %v3756_v56  ;;  %v3825_v56 = vld [vmem:[#allocation11 + $0xf0] sm:$0xff]  }
 0x1df   :  { %2588 = vmatpush1.bf16.msra.mxu1 %v3753_v15  ;;  %2618 = vmatprep.subr.bf16.mxu0 %v3764_v57  ;;  %v3826_v57 = vld [vmem:[#allocation11 + $0xb0] sm:$0xff]  }
 0x1e0   :  { %2589 = vmatprep.subr.bf16.mxu1 %v3761_v58  ;;  %v3827_v58 = vld [vmem:[#allocation11 + $0xe8] sm:$0xff]  }
 0x1e2   :  { %2619 = vmatpush1.bf16.msra.mxu0 %v3762_v59  ;;  %v3828_v59 = vld [vmem:[#allocation11 + $0xa8] sm:$0xff]  }
 0x1e3   :  { %2590 = vmatpush2.bf16.msra.mxu1 %v3759_v60  ;;  %2620 = vmatprep.subr.bf16.mxu0 %v3770_v61 }
 0x1e4   :  { %2591 = vmatprep.subr.bf16.mxu1 %v3767_v62  ;;  %v3829_v62 = vld [vmem:[#allocation11 + $0xe0] sm:$0xff]  }
 0x1e6   :  { %2621 = vmatpush1.bf16.msra.mxu0 %v3768_v19  ;;  %v3830_v19 = vld [vmem:[#allocation11 + $0xa0] sm:$0xff]  }
 0x1e7   :  { %2592 = vmatpush2.bf16.msra.mxu1 %v3765_v63  ;;  %2622 = vmatprep.subr.bf16.mxu0 %v3776_v42 }
 0x1e8   :  { %2593 = vmatprep.subr.bf16.mxu1 %v3773_v0  ;;  %v3831_v0 = vld [vmem:[#allocation11 + $0xd8] sm:$0xff]  }
 0x1ea   :  { %2623 = vmatpush1.bf16.msra.mxu0 %v3774_v3  ;;  %v3832_v3 = vld [vmem:[#allocation11 + $0x98] sm:$0xff]  }
 0x1eb   :  { %2594 = vmatpush2.bf16.msra.mxu1 %v3771_v4  ;;  %2624 = vmatprep.subr.bf16.mxu0 %v3782_v6  ;;  %v3833_v4 = vld [vmem:[#allocation11 + $0xd0] sm:$0xff]   ;;  %v1141_v6 = vld [vmem:[#allocation10] sm:$0xf] }
 0x1ec   :  { %2595 = vmatprep.subr.bf16.mxu1 %v3779_v8  ;;  %v3834_v8 = vld [vmem:[#allocation11 + $0x90] sm:$0xff]  }
 0x1ee   :  { %2625 = vmatpush1.bf16.msra.mxu0 %v3780_v9  ;;  %v1146_v9 = vrot.slane %v1141_v6, %v847_v28 }
 0x1ef   :  { %2596 = vmatpush2.bf16.msra.mxu1 %v3777_v10  ;;  %2626 = vmatprep.subr.bf16.mxu0 %v3788_v11  ;;  %v3835_v10 = vld [vmem:[#allocation11 + $0xc8] sm:$0xff]  }
 0x1f0   :  { %2597 = vmatprep.subr.bf16.mxu1 %v3785_v14  ;;  %v3836_v11 = vld [vmem:[#allocation11 + $0x88] sm:$0xff]   ;;  %v1150_v14 = vrot.slane %v1141_v6, %v851_v30 }
 0x1f2   :  { %2627 = vmatpush1.bf16.msra.mxu0 %v3786_v16 }
 0x1f3   :  { %2598 = vmatpush2.bf16.msra.mxu1 %v3783_v17  ;;  %2628 = vmatprep.subr.bf16.mxu0 %v3794_v18  ;;  %v3837_v17 = vld [vmem:[#allocation11 + $0xc0] sm:$0xff]  }
 0x1f4   :  { %2599 = vmatprep.subr.bf16.mxu1 %v3791_v7  ;;  %v3838_v18 = vld [vmem:[#allocation11 + $0x80] sm:$0xff]  }
 0x1f6   :  { %2629 = vmatpush1.bf16.msra.mxu0 %v3792_v20 }
 0x1f7   :  { %2600 = vmatpush2.bf16.msra.mxu1 %v3789_v21  ;;  %2642 = vmatprep.subr.bf16.mxu0 %v3800_v22 }
 0x1f8   :  { %2601 = vmatprep.subr.bf16.mxu1 %v3797_v23 }
 0x1fa   :  { %2643 = vmatpush2.bf16.msra.mxu0 %v3798_v24 }
 0x1fb   :  { %2602 = vmatpush2.bf16.msra.mxu1 %v3795_v25  ;;  %2644 = vmatprep.subr.bf16.mxu0 %v3806_v1 }
 0x1fc   :  { %2603 = vmatprep.subr.bf16.mxu1 %v3803_v26 }
 0x1fe   :  { %2645 = vmatpush2.bf16.msra.mxu0 %v3804_v27 }
 0x1ff   :  { %2604 = vmatpush2.bf16.msra.mxu1 %v3801_v32  ;;  %3386 = vmatprep.subr.bf16.mxu0 %v3807_v33 }
 0x200   :  { %3408 = vmatprep.subr.bf16.mxu1 %v3823_v5 }
 0x201   :  { %2647 = vmatmul.mubr.bf16.vlgmr.msra.gmra.mxu0 %v4191_v12  ;;  %v3818_v12 = vld [vmem:[#allocation11 + $0x10] sm:$0xff]  }
 0x202   :  { %2606 = vmatmul.mubr.bf16.vlgmr.msra.gmra.mxu1 %v4196_v43  ;;  %3387 = vmatpush3.bf16.msra.mxu0 %v3808_v2  ;;  %v3819_v43 = vld [vmem:[#allocation11 + $0x48] sm:$0xff]  }
 0x203   :  { %3388 = vmatprep.subr.bf16.mxu0 %v3809_v34  ;;  %3409 = vmatpush3.bf16.msra.mxu1 %v3824_v55 }
 0x204   :  { %3410 = vmatprep.subr.bf16.mxu1 %v3825_v56 }
 0x206   :  { %3389 = vmatpush3.bf16.msra.mxu0 %v3810_v35 }
 0x207   :  { %3390 = vmatprep.subr.bf16.mxu0 %v3811_v36  ;;  %3411 = vmatpush3.bf16.msra.mxu1 %v3826_v57 }
 0x208   :  { %3412 = vmatprep.subr.bf16.mxu1 %v3827_v58 }
 0x20a   :  { %3391 = vmatpush3.bf16.msra.mxu0 %v3812_v37 }
 0x20b   :  { %3392 = vmatprep.subr.bf16.mxu0 %v3813_v38  ;;  %3413 = vmatpush3.bf16.msra.mxu1 %v3828_v59 }
 0x20c   :  { %3414 = vmatprep.subr.bf16.mxu1 %v3829_v62 }
 0x20e   :  { %3393 = vmatpush3.bf16.msra.mxu0 %v3814_v13 }
 0x20f   :  { %3394 = vmatprep.subr.bf16.mxu0 %v3815_v39  ;;  %3415 = vmatpush3.bf16.msra.mxu1 %v3830_v19 }
 0x210   :  { %3416 = vmatprep.subr.bf16.mxu1 %v3831_v0 }
 0x212   :  { %3395 = vmatpush3.bf16.msra.mxu0 %v3816_v40 }
 0x213   :  { %3396 = vmatprep.subr.bf16.mxu0 %v3817_v41  ;;  %3417 = vmatpush3.bf16.msra.mxu1 %v3832_v3  ;;  %v1154_v41 = vrot.slane %v1141_v6, %v855_v29 }
 0x214   :  { %3418 = vmatprep.subr.bf16.mxu1 %v3833_v4 }
 0x216   :  { %3397 = vmatpush3.bf16.msra.mxu0 %v3818_v12  ;;  %v1158_v12 = vrot.slane %v1141_v6, %v859_v31 }
 0x217   :  { %3398 = vmatprep.subr.bf16.mxu0 %v3819_v43  ;;  %3419 = vmatpush3.bf16.msra.mxu1 %v3834_v8 }
 0x218   :  { %3420 = vmatprep.subr.bf16.mxu1 %v3835_v10  ;;  %v3384_v10 = vld [vmem:[%s4232_s8] ss:$0 sm:$0xff] }
 0x219   :  { %v2361_v47 = vpop.f32.mrf.mxu0 }
 0x21a   :  { %v2402_v48 = vpop.f32.mrf.mxu1  ;;  %3399 = vmatpush3.bf16.msra.mxu0 %v3820_v44  ;;  %v2362_v16 = vadd.f32 %v2361_v47, %v1146_v9 }
 0x21b   :  { %v2363_v50 = vpop.f32.mrf.mxu0  ;;  %3400 = vmatprep.subr.bf16.mxu0 %v3821_v46  ;;  %3421 = vmatpush3.bf16.msra.mxu1 %v3836_v11 }
 0x21c   :  { %v2404_v52 = vpop.f32.mrf.mxu1  ;;  %v2364_v7 = vadd.f32 %v2363_v50, %v1150_v14  ;;  %3422 = vmatprep.subr.bf16.mxu1 %v3837_v17  ;;  %v2403_v20 = vadd.f32 %v2402_v48, %v2362_v16  ;;  %v3385_v17 = vld [vmem:[#allocation2] ss:$0 sm:$0xff] }
 0x21d   :  { %v2365_v53 = vpop.f32.mrf.mxu0 }
 0x21e   :  { %v2406_v54 = vpop.f32.mrf.mxu1  ;;  %3401 = vmatpush3.bf16.msra.mxu0 %v3822_v49  ;;  %v2405_v22 = vadd.f32 %v2404_v52, %v2364_v7 }
 0x21f   :  { %v2366_v45 = vpop.f32.mrf.mxu0  ;;  %3423 = vmatpush3.bf16.msra.mxu1 %v3838_v18 }
 0x220   :  { %v2407_v15 = vpop.f32.mrf.mxu1 }
 0x242   :  { %v2484_v60 = vpop.f32.mrf.mxu1 }
 0x244   :  { %v2486_v61 = vpop.f32.mrf.mxu1 }
 0x246   :  { %v2488_v63 = vpop.f32.mrf.mxu1 }
 0x247   :  { %v3351_v63 = vld [vmem:[%s4231_s7] ss:$0 sm:$0xff] }
 0x248   :  { %v2489_v42 = vpop.f32.mrf.mxu1 }
 0x259   :  { %v2443_v21 = vpop.f32.mrf.mxu0 }
 0x25a   :  { %v2444_v23 = vadd.f32 %v2443_v21, %v2403_v20 }
 0x25b   :  { %v2445_v24 = vpop.f32.mrf.mxu0 }
 0x25c   :  { %v2485_v25 = vadd.f32 %v2484_v60, %v2444_v23  ;;  %v2446_v28 = vadd.f32 %v2445_v24, %v2405_v22 }
 0x25d   :  { %v2447_v1 = vpop.f32.mrf.mxu0 }
 0x25e   :  { %v2487_v26 = vadd.f32 %v2486_v61, %v2446_v28  ;;  %3855 = vtanh.f32 %v2485_v25 }
 0x25f   :  { %v2448_v27 = vpop.f32.mrf.mxu0 }
 0x260   :  { %3857 = vtanh.f32 %v2487_v26 }
 0x26b   :  { %v3856_v30 = vpop.eup %3855 }
 0x26c   :  { %v2659_v2 = vpack.c.bf16 %v3856_v30, %v3856_v30 }
 0x26d   :  { %v3858_v32 = vpop.eup %3857 }
 0x26e   :  { %v2660_v33 = vpack.c.bf16 %v3858_v32, %v3858_v32 }
 0x270   :  { %2958 = vmatprep.mubr.bf16.mxu0 %v2660_v33 }
 0x271   :  { %2959 = vmatmul.mubr.bf16.vlgmr.msra.gmra.mxu0 %v2659_v2 }
 0x282   :  { %v2525_v34 = vpop.f32.mrf.mxu1 }
 0x283   :  { %v2526_v43 = vadd.f32 %v2525_v34, %v1154_v41 }
 0x284   :  { %v2527_v35 = vpop.f32.mrf.mxu1 }
 0x285   :  { %v2528_v44 = vadd.f32 %v2527_v35, %v1158_v12 }
 0x286   :  { %v2529_v36 = vpop.f32.mrf.mxu1 }
 0x288   :  { %v2530_v37 = vpop.f32.mrf.mxu1 }
 0x299   :  { %v2566_v38 = vpop.f32.mrf.mxu0 }
 0x29a   :  { %v2567_v46 = vadd.f32 %v2566_v38, %v2526_v43 }
 0x29b   :  { %v2568_v13 = vpop.f32.mrf.mxu0 }
 0x29c   :  { %v2569_v49 = vadd.f32 %v2568_v13, %v2528_v44 }
 0x29d   :  { %v2570_v39 = vpop.f32.mrf.mxu0 }
 0x29f   :  { %v2571_v40 = vpop.f32.mrf.mxu0 }
 0x2c1   :  { %v2648_v47 = vpop.f32.mrf.mxu0 }
 0x2c2   :  { %v2607_v48 = vpop.f32.mrf.mxu1 }
 0x2c3   :  { %v2608_v50 = vadd.f32 %v2607_v48, %v2567_v46  ;;  %v2650_v52 = vpop.f32.mrf.mxu0 }
 0x2c4   :  { %v2609_v53 = vpop.f32.mrf.mxu1 }
 0x2c5   :  { %v2649_v54 = vadd.f32 %v2648_v47, %v2608_v50  ;;  %v2610_v45 = vadd.f32 %v2609_v53, %v2569_v49  ;;  %v2652_v5 = vpop.f32.mrf.mxu0 }
 0x2c6   :  { %v2611_v55 = vpop.f32.mrf.mxu1 }
 0x2c7   :  { %v2651_v56 = vadd.f32 %v2650_v52, %v2610_v45  ;;  %v2653_v15 = vpop.f32.mrf.mxu0  ;;  %3859 = vtanh.f32 %v2649_v54 }
 0x2c8   :  { %v2612_v29 = vpop.f32.mrf.mxu1 }
 0x2c9   :  { %3861 = vtanh.f32 %v2651_v56 }
 0x2d4   :  { %v3860_v51 = vpop.eup %3859 }
 0x2d5   :  { %v2661_v58 = vpack.c.bf16 %v3860_v51, %v3860_v51 }
 0x2d6   :  { %v3862_v31 = vpop.eup %3861 }
 0x2d7   :  { %v2662_v57 = vpack.c.bf16 %v3862_v31, %v3862_v31 }
 0x2d9   :  { %2998 = vmatprep.mubr.bf16.mxu1 %v2662_v57 }
 0x2da   :  { %2999 = vmatmul.mubr.bf16.vlgmr.msra.gmra.mxu1 %v2661_v58 }
 0x331   :  { %v3402_v59 = vpop.f32.mrf.mxu0 }
 0x333   :  { %v3403_v60 = vpop.f32.mrf.mxu0 }
 0x334   :  { %v3404_v61 = vadd.f32 %v3403_v60, %v3402_v59 }
 0x335   :  { %v3405_v62 = vpop.f32.mrf.mxu0 }
 0x336   :  { %v2961_v3 = vadd.f32 %v3404_v61, %v3351_v63 }
 0x337   :  { %v3406_v19 = vpop.f32.mrf.mxu0 }
 0x39a   :  { %v3424_v42 = vpop.f32.mrf.mxu1 }
 0x39c   :  { %v3425_v0 = vpop.f32.mrf.mxu1 }
 0x39d   :  { %v3426_v4 = vadd.f32 %v3425_v0, %v3424_v42 }
 0x39e   :  { %v3427_v6 = vpop.f32.mrf.mxu1 }
 0x39f   :  { %v3001_v8 = vadd.f32 %v3426_v4, %v2961_v3 }
 0x3a0   :  { %v3428_v9 = vpop.f32.mrf.mxu1 }
 0x3a1   :  { %3863 = vtanh.f32 %v3001_v8 }
 0x3ae   :  { %v3864_v11 = vpop.eup %3863 }
 0x3af   :  { %v3014_v14 = vmul.f32 %v3864_v11, %v3384_v10 }
 0x3b1   :  { %v3016_v16 = vsel %vm3015_vm3, %v3014_v14, 0.0 }
 0x3b2   :  { %3017 = vadd.xlane.f32.xlu0 %v3016_v16 }
 0x43b   :  { %v3018_v18 = vpop.xlane.xlu0 %3017 }
 0x43c   :  { %v3026_v7 = vadd.f32 %v3385_v17, %v3018_v18 }
 0x43e   :  { %3028 = vst.msk [vmem:[%s4234_s10] sm:$0x3] %vm3027_vm4, %v3026_v7 }
 0x43f   :  { %3033 = vsyncpa [#allocation4], 1 }
 0x440   :  { %3034 = vsyncpa [#allocation6], 1 }
 0x441   :  { %3035 = vsyncpa [#allocation9], 1 }
 0x442   :  { %3036 = vsyncpa [#allocation12], 1 }

</bundles_post_ra>
